<compile_context>
chip_gen: v6e
topology: v6e:2x2x1
jax: 0.10.0
libtpu: 0.0.40
codegen_flags: <defaults>
</compile_context>

<pallas_src>
import functools

import jax
import jax.numpy as jnp
from jax.experimental import pallas as pl
from jax.experimental.pallas import tpu as pltpu


def _round_up(x, m):
    return (x + m - 1) // m * m


def _vmem_physical_bytes():
    """Generation-specific physical VMEM (128 MiB v5e/v6e, 64 MiB/TC v7x)."""
    try:
        return int(pltpu.get_tpu_info().vmem_capacity_bytes)
    except Exception:
        return 64 * 1024 * 1024          # conservative (v7x-sized) fallback


def _rnn_kernel(n_head, n_tail, t_chunk,
                x_ref, w_in_ref, w_mid_ref, w_i2h_ref, w_fc_ref, b_ref,
                o_ref, h_ref, act_ref):
    # CORRECTNESS NOTE: the hidden-state carry (h_ref) requires the time-chunk
    # axis to be the LAST ("arbitrary", sequential) grid axis; it is reset at
    # ci == 0 for every batch block.  Do not reorder the grid.
    ci = pl.program_id(1)

    @pl.when(ci == 0)
    def _():
        h_ref[...] = jnp.zeros_like(h_ref)     # rnn_cell.init_hidden -> zeros

    t = t_chunk
    b_block, p = h_ref.shape
    rows = t * b_block
    o_pad = o_ref.shape[-1]
    w_dtype = w_in_ref.dtype                   # bf16 (fast path) or f32 (exact path)

    def bias(li):                              # (1, p) slice of the packed bias tensor
        return b_ref[li][:, :p]

    # ---- head MLP: hoisted out of the recurrence, batched over t*b rows ----
    a = x_ref[...].reshape(rows, x_ref.shape[-1]).astype(w_dtype)
    a = jnp.maximum(
        jnp.dot(a, w_in_ref[...], preferred_element_type=jnp.float32) + bias(0), 0.0)
    for l in range(n_head - 1):
        a = jnp.maximum(
            jnp.dot(a.astype(w_dtype), w_mid_ref[l],
                    preferred_element_type=jnp.float32) + bias(1 + l), 0.0)

    # fold the i2h bias once per chunk (it would otherwise be re-broadcast/added
    # on every serial timestep), then stage the head output in VMEM scratch to
    # bound live ranges.
    a = a + bias(n_head)
    act_ref[...] = a

    # ---- recurrence: only this (b_block, P) x (P, P) matmul is sequential ----
    w_i2h = w_i2h_ref[...]                     # kept in f32: no compounding rounding

    def step(s, h):
        off = pl.multiple_of(s * b_block, 8)
        xt = act_ref[pl.ds(off, b_block), :]
        h = jnp.maximum(
            jnp.dot(h, w_i2h, preferred_element_type=jnp.float32) + xt, 0.0)
        act_ref[pl.ds(off, b_block), :] = h    # stash hidden for the tail MLP
        return h

    h_ref[...] = jax.lax.fori_loop(0, t, step, h_ref[...], unroll=min(t, 8))

    # ---- tail MLP + fc: hoisted, batched over t*b rows (read off the scratch) ----
    y = act_ref[...]
    for l in range(n_tail):
        y = jnp.maximum(
            jnp.dot(y.astype(w_dtype), w_mid_ref[n_head - 1 + l],
                    preferred_element_type=jnp.float32) + bias(n_head + 1 + l), 0.0)
    y = (jnp.dot(y.astype(w_dtype), w_fc_ref[...],
                 preferred_element_type=jnp.float32)
         + b_ref[n_head + 1 + n_tail][:, :o_pad])          # final fc (no ReLU)

    # lane-dense (multiple-of-128 lanes) contiguous output slab for this chunk
    o_ref[...] = y.reshape(t, b_block, o_pad).astype(o_ref.dtype)


def custom_relu_rnn_forward(x, head_params, i2h_params, tail_params, fc_params,
                            *, t_chunk=None, use_bf16=True):
    """x: (batch, seq_len, input_size) f32. Returns (batch, seq_len, output_size) f32."""
    B, S, I = x.shape
    H = i2h_params[0][0].shape[1]
    O = fc_params[-1][0].shape[1]

    n_head = len(head_params)
    n_tail = len(tail_params)
    L = n_head + 1 + n_tail + 1                 # head..., i2h, tail..., fc

    # Feature paddings: input / internal / output are padded independently so the
    # x and output slabs only carry round_up(I,128) / round_up(O,128) lanes.
    inner_dims = [H] + [w.shape[1] for (w, _) in head_params] \
                     + [w.shape[1] for (w, _) in tail_params]
    P = _round_up(max(inner_dims), 128)
    I_pad = _round_up(I, 128)
    O_pad = _round_up(O, 128)
    PB = max(P, O_pad)                          # packed-bias lane width

    # Batch blocking: fill MXU rows (256 on v6e/v7x) when the batch allows, and
    # keep >= 2 blocks when possible so the "parallel" axis shards across v7x's
    # two TensorCores.
    B8 = _round_up(B, 8)
    if B8 >= 512:
        b_block = 256
    elif B8 >= 256:
        b_block = 128
    else:
        b_block = B8
    B_pad = _round_up(B8, b_block)
    n_b_blocks = B_pad // b_block

    # ---- pack + zero-pad parameters (padding is exact: padded lanes stay zero) ----
    w_dtype = jnp.bfloat16 if use_bf16 else jnp.float32
    x_dtype = w_dtype                            # matmul operand dtype; bias stays f32

    mid_layers = list(head_params[1:]) + list(tail_params)
    L_mid = max(len(mid_layers), 1)

    w0, _ = head_params[0]                       # (I, h1)
    w_in = jnp.zeros((I_pad, P), jnp.float32).at[:w0.shape[0], :w0.shape[1]].set(w0)
    w_mid = jnp.zeros((L_mid, P, P), jnp.float32)
    for l, (w, _) in enumerate(mid_layers):
        w_mid = w_mid.at[l, :w.shape[0], :w.shape[1]].set(w)
    w_h, _ = i2h_params[0]
    w_i2h = jnp.zeros((P, P), jnp.float32).at[:w_h.shape[0], :w_h.shape[1]].set(w_h)
    w_f, _ = fc_params[0]
    w_fc = jnp.zeros((P, O_pad), jnp.float32).at[:w_f.shape[0], :w_f.shape[1]].set(w_f)

    all_layers = list(head_params) + list(i2h_params) + list(tail_params) + list(fc_params)
    b_all = jnp.zeros((L, 1, PB), jnp.float32)
    for l, (_, b) in enumerate(all_layers):
        b_all = b_all.at[l, 0, :b.shape[0]].set(b)

    w_in = w_in.astype(w_dtype)
    w_mid = w_mid.astype(w_dtype)
    w_fc = w_fc.astype(w_dtype)
    # w_i2h deliberately stays f32 (serial recurrence must not compound bf16 error)

    itm = 2 if use_bf16 else 4
    weight_bytes = (int(w_in.size) + int(w_mid.size) + int(w_fc.size)) * itm \
                   + int(w_i2h.size) * 4 + int(b_all.size) * 4

    # ---- time chunking sized against the generation's physical VMEM ----
    vmem_phys = _vmem_physical_bytes()
    if t_chunk is None:
        per_t = (2 * b_block * I_pad * itm       # x slab (double-buffered)
                 + 2 * b_block * O_pad * 4       # out slab (double-buffered)
                 + b_block * P * 4)              # activation scratch (single)
        budget = int(0.6 * vmem_phys)
        t_cap = max(1, (budget - weight_bytes - b_block * P * 4) // max(per_t, 1))
        t_chunk = int(max(1, min(S, 64, t_cap)))
    S_pad = _round_up(S, t_chunk)
    n_t_chunks = S_pad // t_chunk

    # ---- input: (B, S, I) -> (S_pad, B_pad, I_pad), zero-padded, time-major ----
    x_sbi = jnp.transpose(x, (1, 0, 2))
    x_pad = jnp.zeros((S_pad, B_pad, I_pad), x_dtype).at[:S, :B, :I].set(
        x_sbi.astype(x_dtype))

    # ---- VMEM budget (weights single-buffered, in/out slabs double-buffered) ----
    blk_in = t_chunk * b_block * I_pad * itm
    blk_out = t_chunk * b_block * O_pad * 4
    scratch_bytes = b_block * P * 4 + t_chunk * b_block * P * 4
    vmem_est = 2 * (blk_in + blk_out) + weight_bytes + scratch_bytes
    vmem_limit = int(min(int(0.9 * vmem_phys),
                         max(8 * 1024 * 1024, int(1.5 * vmem_est))))

    kernel = functools.partial(_rnn_kernel, n_head, n_tail, t_chunk)

    grid = (n_b_blocks, n_t_chunks)
    # The hidden-state carry requires the time-chunk axis to be LAST (sequential).
    assert grid[-1] == n_t_chunks

    def _call(single_buffer_weights):
        def const_spec(shape):
            imap = lambda bi, ci: (0,) * len(shape)
            if single_buffer_weights:
                # grid-constant input -> one DMA; single buffer halves weight VMEM
                return pl.BlockSpec(shape, imap, pipeline_mode=pl.Buffered(1))
            return pl.BlockSpec(shape, imap)

        return pl.pallas_call(
            kernel,
            out_shape=jax.ShapeDtypeStruct((S_pad, B_pad, O_pad), jnp.float32),
            grid_spec=pltpu.PrefetchScalarGridSpec(
                num_scalar_prefetch=0,
                grid=grid,
                in_specs=[
                    pl.BlockSpec((t_chunk, b_block, I_pad), lambda bi, ci: (ci, bi, 0)),
                    const_spec((I_pad, P)),
                    const_spec((L_mid, P, P)),
                    const_spec((P, P)),
                    const_spec((P, O_pad)),
                    const_spec((L, 1, PB)),
                ],
                out_specs=pl.BlockSpec((t_chunk, b_block, O_pad),
                                       lambda bi, ci: (ci, bi, 0)),
                scratch_shapes=[
                    pltpu.VMEM((b_block, P), jnp.float32),            # hidden carry
                    pltpu.VMEM((t_chunk * b_block, P), jnp.float32),  # staged activations
                ],
            ),
            compiler_params=pltpu.CompilerParams(
                dimension_semantics=("parallel", "arbitrary"),
                vmem_limit_bytes=vmem_limit,
            ),
        )(x_pad, w_in, w_mid, w_i2h, w_fc, b_all)

    try:
        out_pad = _call(True)
    except Exception:
        # pipeline_mode / Buffered(1) unsupported on this jax build -> default buffering
        out_pad = _call(False)

    # strip padding, back to PyTorch (batch, seq, output) convention
    return jnp.transpose(out_pad[:S, :B, :O], (1, 0, 2))


# ---------------- parameter construction (deterministic, in-script) ----------------

def make_linear(key, in_f, out_f, custom_init):
    kw, kb = jax.random.split(key)
    if custom_init:
        # module's init_weights: weight ~ N(0, sqrt(2/in_features))
        stdev = (2.0 / in_f) ** 0.5
        w = stdev * jax.random.normal(kw, (out_f, in_f), jnp.float32)
    else:
        # PyTorch default Linear init (i2h is not re-initialized)
        bound = 1.0 / (in_f ** 0.5)
        w = jax.random.uniform(kw, (out_f, in_f), jnp.float32, -bound, bound)
    bound = 1.0 / (in_f ** 0.5)
    b = jax.random.uniform(kb, (out_f,), jnp.float32, -bound, bound)
    return w, b                                 # PyTorch (out, in) layout


def build_params(key, input_size, hidden_size, output_size, hidden_layers, output_layers):
    head_params, tail_params = [], []
    lin_in = input_size
    for h in list(hidden_layers) + [hidden_size]:
        key, sub = jax.random.split(key)
        w, b = make_linear(sub, lin_in, h, custom_init=True)
        head_params.append((w.T, b))            # pre-transpose to (in, out)
        lin_in = h
    key, sub = jax.random.split(key)
    w, b = make_linear(sub, hidden_size, hidden_size, custom_init=False)
    w = jnp.triu(w)                             # SimpleRNNCell.make_weights_upper_triangular
    i2h_params = [(w.T, b)]
    lin_in = hidden_size
    for o in output_layers:
        key, sub = jax.random.split(key)
        w, b = make_linear(sub, lin_in, o, custom_init=True)
        tail_params.append((w.T, b))
        lin_in = o
    key, sub = jax.random.split(key)
    w, b = make_linear(sub, lin_in, output_size, custom_init=True)
    fc_params = [(w.T, b)]
    return head_params, i2h_params, tail_params, fc_params


# ---------------- pure-JAX reference for verification ----------------

def reference_forward(x, head_params, i2h_params, tail_params, fc_params):
    B, S, _ = x.shape
    H = i2h_params[0][0].shape[1]
    hidden = jnp.zeros((B, H), jnp.float32)
    outs = []
    for t in range(S):
        xt = x[:, t, :]
        for w, b in head_params:
            xt = jnp.maximum(xt @ w + b, 0.0)
        w_h, b_h = i2h_params[0]
        hidden = jnp.maximum(hidden @ w_h + b_h + xt, 0.0)
        y = hidden
        for w, b in tail_params:
            y = jnp.maximum(y @ w + b, 0.0)
        w_f, b_f = fc_params[0]
        outs.append((y @ w_f + b_f)[:, None, :])
    return jnp.concatenate(outs, axis=1)


if __name__ == "__main__":
    # Small, module-consistent shapes.
    batch, seq_len = 2, 8
    input_size, hidden_size, output_size = 16, 32, 8
    hidden_layers = [32]
    output_layers = [32]

    key = jax.random.PRNGKey(0)
    key, kx = jax.random.split(key)
    x = jax.random.normal(kx, (batch, seq_len, input_size), jnp.float32)

    head_p, i2h_p, tail_p, fc_p = build_params(
        key, input_size, hidden_size, output_size, hidden_layers, output_layers)

    ref = reference_forward(x, head_p, i2h_p, tail_p, fc_p)

    # Exact path (f32 matmuls); t_chunk=4 -> 2 sequential chunks, exercises the
    # cross-chunk hidden-state carry.
    out_f32 = jax.block_until_ready(
        custom_relu_rnn_forward(x, head_p, i2h_p, tail_p, fc_p,
                                t_chunk=4, use_bf16=False))
    assert out_f32.shape == (batch, seq_len, output_size)
    assert jnp.allclose(out_f32, ref, atol=3e-4, rtol=3e-4), "f32 mismatch vs reference"

    # Fast path (bf16 matmul operands for the hoisted MLPs; recurrence stays f32).
    out_bf16 = jax.block_until_ready(
        custom_relu_rnn_forward(x, head_p, i2h_p, tail_p, fc_p,
                                t_chunk=4, use_bf16=True))
    assert out_bf16.shape == (batch, seq_len, output_size)
    assert jnp.allclose(out_bf16, ref, atol=1e-1, rtol=1e-1), "bf16 path drifted too far"

    # Auto t_chunk / VMEM-budget path.
    out_auto = jax.block_until_ready(
        custom_relu_rnn_forward(x, head_p, i2h_p, tail_p, fc_p, use_bf16=True))
    assert out_auto.shape == (batch, seq_len, output_size)
    assert jnp.allclose(out_auto, ref, atol=1e-1, rtol=1e-1), "auto-chunk path drifted"

    print("KERNEL_OK")
</pallas_src>

<mosaic_0001>
module attributes {stable_mosaic.version = 11 : i64} {
  func.func @_rnn_kernel(%arg0: i32, %arg1: i32, %arg2: memref<4x8x128xf32, #tpu.memory_space<vmem>>, %arg3: memref<128x128xf32, #tpu.memory_space<vmem>>, %arg4: memref<2x128x128xf32, #tpu.memory_space<vmem>>, %arg5: memref<128x128xf32, #tpu.memory_space<vmem>>, %arg6: memref<128x128xf32, #tpu.memory_space<vmem>>, %arg7: memref<5x1x128xf32, #tpu.memory_space<vmem>>, %arg8: memref<4x8x128xf32, #tpu.memory_space<vmem>>, %arg9: memref<8x128xf32, #tpu.memory_space<vmem>>, %arg10: memref<32x128xf32, #tpu.memory_space<vmem>>) attributes {dimension_semantics = [#tpu.dimension_semantics<parallel>, #tpu.dimension_semantics<arbitrary>], iteration_bounds = array<i64: 1, 2>, scalar_prefetch = 0 : i64, scratch_operands = 2 : i64, tpu.core_type = #tpu.core_type<tc>, window_params = [{transform_indices = @transform_0, window_bounds = array<i64: 4, 8, 128>}, {pipeline_mode = #tpu.pipeline_mode<synchronous>, transform_indices = @transform_1, window_bounds = array<i64: 128, 128>}, {pipeline_mode = #tpu.pipeline_mode<synchronous>, transform_indices = @transform_2, window_bounds = array<i64: 2, 128, 128>}, {pipeline_mode = #tpu.pipeline_mode<synchronous>, transform_indices = @transform_3, window_bounds = array<i64: 128, 128>}, {pipeline_mode = #tpu.pipeline_mode<synchronous>, transform_indices = @transform_4, window_bounds = array<i64: 128, 128>}, {pipeline_mode = #tpu.pipeline_mode<synchronous>, transform_indices = @transform_5, window_bounds = array<i64: 5, 1, 128>}, {transform_indices = @transform_6, window_bounds = array<i64: 4, 8, 128>}]} {
    %c0_i32 = arith.constant 0 : i32
    %0 = arith.cmpi eq, %arg1, %c0_i32 : i32
    %1 = arith.extui %0 : i1 to i32
    %c0_i32_0 = arith.constant 0 : i32
    %2 = arith.cmpi ne, %1, %c0_i32_0 : i32
    scf.if %2 {
      %cst_63 = arith.constant 0.000000e+00 : f32
      %88 = vector.broadcast %cst_63 : f32 to vector<8x128xf32>
      %c0_64 = arith.constant 0 : index
      %c0_65 = arith.constant 0 : index
      %89 = vector.load %arg9[%c0_64, %c0_65] : memref<8x128xf32, #tpu.memory_space<vmem>>, vector<8x128xf32>
      tpu.vector_store %arg9[%c0_64, %c0_65], %88 {strides = array<i32>} : memref<8x128xf32, #tpu.memory_space<vmem>>, vector<8x128xf32>,
    } else {
    }
    %c0 = arith.constant 0 : index
    %c0_1 = arith.constant 0 : index
    %c0_2 = arith.constant 0 : index
    %3 = vector.load %arg2[%c0, %c0_1, %c0_2] : memref<4x8x128xf32, #tpu.memory_space<vmem>>, vector<4x8x128xf32>
    %4 = vector.shape_cast %3 : vector<4x8x128xf32> to vector<32x128xf32>
    %c0_3 = arith.constant 0 : index
    %c0_4 = arith.constant 0 : index
    %5 = vector.load %arg3[%c0_3, %c0_4] : memref<128x128xf32, #tpu.memory_space<vmem>>, vector<128x128xf32>
    %cst = arith.constant dense<0.000000e+00> : vector<32x128xf32>
    %6 = tpu.matmul %4, %5, %cst {dimension_numbers = #tpu.dot_dimension_numbers<[1], [0], [0], [1], [0, 0, 1, 1], [], []>} : vector<32x128xf32>, vector<128x128xf32>, vector<32x128xf32> -> vector<32x128xf32>
    %c0_5 = arith.constant 0 : index
    %c0_6 = arith.constant 0 : index
    %c0_7 = arith.constant 0 : index
    %7 = vector.load %arg7[%c0_5, %c0_6, %c0_7] : memref<5x1x128xf32, #tpu.memory_space<vmem>>, vector<1x1x128xf32>
    %8 = vector.shape_cast %7 : vector<1x1x128xf32> to vector<1x128xf32>
    %9 = vector.broadcast %8 : vector<1x128xf32> to vector<32x128xf32>
    %10 = arith.addf %6, %9 : vector<32x128xf32>
    %cst_8 = arith.constant 0.000000e+00 : f32
    %11 = vector.broadcast %cst_8 : f32 to vector<32x128xf32>
    %12 = arith.maximumf %10, %11 : vector<32x128xf32>
    %c0_9 = arith.constant 0 : index
    %c0_10 = arith.constant 0 : index
    %c0_11 = arith.constant 0 : index
    %13 = vector.load %arg4[%c0_9, %c0_10, %c0_11] : memref<2x128x128xf32, #tpu.memory_space<vmem>>, vector<1x128x128xf32>
    %14 = vector.shape_cast %13 : vector<1x128x128xf32> to vector<128x128xf32>
    %cst_12 = arith.constant dense<0.000000e+00> : vector<32x128xf32>
    %15 = tpu.matmul %12, %14, %cst_12 {dimension_numbers = #tpu.dot_dimension_numbers<[1], [0], [0], [1], [0, 0, 1, 1], [], []>} : vector<32x128xf32>, vector<128x128xf32>, vector<32x128xf32> -> vector<32x128xf32>
    %c1 = arith.constant 1 : index
    %c0_13 = arith.constant 0 : index
    %c0_14 = arith.constant 0 : index
    %16 = vector.load %arg7[%c1, %c0_13, %c0_14] : memref<5x1x128xf32, #tpu.memory_space<vmem>>, vector<1x1x128xf32>
    %17 = vector.shape_cast %16 : vector<1x1x128xf32> to vector<1x128xf32>
    %18 = vector.broadcast %17 : vector<1x128xf32> to vector<32x128xf32>
    %19 = arith.addf %15, %18 : vector<32x128xf32>
    %cst_15 = arith.constant 0.000000e+00 : f32
    %20 = vector.broadcast %cst_15 : f32 to vector<32x128xf32>
    %21 = arith.maximumf %19, %20 : vector<32x128xf32>
    %c2 = arith.constant 2 : index
    %c0_16 = arith.constant 0 : index
    %c0_17 = arith.constant 0 : index
    %22 = vector.load %arg7[%c2, %c0_16, %c0_17] : memref<5x1x128xf32, #tpu.memory_space<vmem>>, vector<1x1x128xf32>
    %23 = vector.shape_cast %22 : vector<1x1x128xf32> to vector<1x128xf32>
    %24 = vector.broadcast %23 : vector<1x128xf32> to vector<32x128xf32>
    %25 = arith.addf %21, %24 : vector<32x128xf32>
    %c0_18 = arith.constant 0 : index
    %c0_19 = arith.constant 0 : index
    %26 = vector.load %arg10[%c0_18, %c0_19] : memref<32x128xf32, #tpu.memory_space<vmem>>, vector<32x128xf32>
    tpu.vector_store %arg10[%c0_18, %c0_19], %25 {strides = array<i32>} : memref<32x128xf32, #tpu.memory_space<vmem>>, vector<32x128xf32>,
    %c0_20 = arith.constant 0 : index
    %c0_21 = arith.constant 0 : index
    %27 = vector.load %arg5[%c0_20, %c0_21] : memref<128x128xf32, #tpu.memory_space<vmem>>, vector<128x128xf32>
    %c0_22 = arith.constant 0 : index
    %c0_23 = arith.constant 0 : index
    %28 = vector.load %arg9[%c0_22, %c0_23] : memref<8x128xf32, #tpu.memory_space<vmem>>, vector<8x128xf32>
    %c0_i32_24 = arith.constant 0 : i32
    %c8_i32 = arith.constant 8 : i32
    %29 = arith.muli %c0_i32_24, %c8_i32 : i32
    %30 = tpu.assume_multiple %29, 8 : i32
    %31 = arith.index_cast %30 : i32 to index
    %c0_25 = arith.constant 0 : index
    %32 = vector.load %arg10[%31, %c0_25] : memref<32x128xf32, #tpu.memory_space<vmem>>, vector<8x128xf32>
    %cst_26 = arith.constant dense<0.000000e+00> : vector<8x128xf32>
    %33 = tpu.matmul %28, %27, %cst_26 {dimension_numbers = #tpu.dot_dimension_numbers<[1], [0], [0], [1], [0, 0, 1, 1], [], []>} : vector<8x128xf32>, vector<128x128xf32>, vector<8x128xf32> -> vector<8x128xf32>
    %34 = arith.addf %33, %32 : vector<8x128xf32>
    %cst_27 = arith.constant 0.000000e+00 : f32
    %35 = vector.broadcast %cst_27 : f32 to vector<8x128xf32>
    %36 = arith.maximumf %34, %35 : vector<8x128xf32>
    %37 = arith.index_cast %30 : i32 to index
    %c0_28 = arith.constant 0 : index
    %38 = vector.load %arg10[%37, %c0_28] : memref<32x128xf32, #tpu.memory_space<vmem>>, vector<8x128xf32>
    tpu.vector_store %arg10[%37, %c0_28], %36 {strides = array<i32>} : memref<32x128xf32, #tpu.memory_space<vmem>>, vector<8x128xf32>,
    %c1_i32 = arith.constant 1 : i32
    %c8_i32_29 = arith.constant 8 : i32
    %39 = arith.muli %c1_i32, %c8_i32_29 : i32
    %40 = tpu.assume_multiple %39, 8 : i32
    %41 = arith.index_cast %40 : i32 to index
    %c0_30 = arith.constant 0 : index
    %42 = vector.load %arg10[%41, %c0_30] : memref<32x128xf32, #tpu.memory_space<vmem>>, vector<8x128xf32>
    %cst_31 = arith.constant dense<0.000000e+00> : vector<8x128xf32>
    %43 = tpu.matmul %36, %27, %cst_31 {dimension_numbers = #tpu.dot_dimension_numbers<[1], [0], [0], [1], [0, 0, 1, 1], [], []>} : vector<8x128xf32>, vector<128x128xf32>, vector<8x128xf32> -> vector<8x128xf32>
    %44 = arith.addf %43, %42 : vector<8x128xf32>
    %cst_32 = arith.constant 0.000000e+00 : f32
    %45 = vector.broadcast %cst_32 : f32 to vector<8x128xf32>
    %46 = arith.maximumf %44, %45 : vector<8x128xf32>
    %47 = arith.index_cast %40 : i32 to index
    %c0_33 = arith.constant 0 : index
    %48 = vector.load %arg10[%47, %c0_33] : memref<32x128xf32, #tpu.memory_space<vmem>>, vector<8x128xf32>
    tpu.vector_store %arg10[%47, %c0_33], %46 {strides = array<i32>} : memref<32x128xf32, #tpu.memory_space<vmem>>, vector<8x128xf32>,
    %c2_i32 = arith.constant 2 : i32
    %c8_i32_34 = arith.constant 8 : i32
    %49 = arith.muli %c2_i32, %c8_i32_34 : i32
    %50 = tpu.assume_multiple %49, 8 : i32
    %51 = arith.index_cast %50 : i32 to index
    %c0_35 = arith.constant 0 : index
    %52 = vector.load %arg10[%51, %c0_35] : memref<32x128xf32, #tpu.memory_space<vmem>>, vector<8x128xf32>
    %cst_36 = arith.constant dense<0.000000e+00> : vector<8x128xf32>
    %53 = tpu.matmul %46, %27, %cst_36 {dimension_numbers = #tpu.dot_dimension_numbers<[1], [0], [0], [1], [0, 0, 1, 1], [], []>} : vector<8x128xf32>, vector<128x128xf32>, vector<8x128xf32> -> vector<8x128xf32>
    %54 = arith.addf %53, %52 : vector<8x128xf32>
    %cst_37 = arith.constant 0.000000e+00 : f32
    %55 = vector.broadcast %cst_37 : f32 to vector<8x128xf32>
    %56 = arith.maximumf %54, %55 : vector<8x128xf32>
    %57 = arith.index_cast %50 : i32 to index
    %c0_38 = arith.constant 0 : index
    %58 = vector.load %arg10[%57, %c0_38] : memref<32x128xf32, #tpu.memory_space<vmem>>, vector<8x128xf32>
    tpu.vector_store %arg10[%57, %c0_38], %56 {strides = array<i32>} : memref<32x128xf32, #tpu.memory_space<vmem>>, vector<8x128xf32>,
    %c3_i32 = arith.constant 3 : i32
    %c8_i32_39 = arith.constant 8 : i32
    %59 = arith.muli %c3_i32, %c8_i32_39 : i32
    %60 = tpu.assume_multiple %59, 8 : i32
    %61 = arith.index_cast %60 : i32 to index
    %c0_40 = arith.constant 0 : index
    %62 = vector.load %arg10[%61, %c0_40] : memref<32x128xf32, #tpu.memory_space<vmem>>, vector<8x128xf32>
    %cst_41 = arith.constant dense<0.000000e+00> : vector<8x128xf32>
    %63 = tpu.matmul %56, %27, %cst_41 {dimension_numbers = #tpu.dot_dimension_numbers<[1], [0], [0], [1], [0, 0, 1, 1], [], []>} : vector<8x128xf32>, vector<128x128xf32>, vector<8x128xf32> -> vector<8x128xf32>
    %64 = arith.addf %63, %62 : vector<8x128xf32>
    %cst_42 = arith.constant 0.000000e+00 : f32
    %65 = vector.broadcast %cst_42 : f32 to vector<8x128xf32>
    %66 = arith.maximumf %64, %65 : vector<8x128xf32>
    %67 = arith.index_cast %60 : i32 to index
    %c0_43 = arith.constant 0 : index
    %68 = vector.load %arg10[%67, %c0_43] : memref<32x128xf32, #tpu.memory_space<vmem>>, vector<8x128xf32>
    tpu.vector_store %arg10[%67, %c0_43], %66 {strides = array<i32>} : memref<32x128xf32, #tpu.memory_space<vmem>>, vector<8x128xf32>,
    %c4_i32 = arith.constant 4 : i32
    %c0_44 = arith.constant 0 : index
    %c0_45 = arith.constant 0 : index
    %69 = vector.load %arg9[%c0_44, %c0_45] : memref<8x128xf32, #tpu.memory_space<vmem>>, vector<8x128xf32>
    tpu.vector_store %arg9[%c0_44, %c0_45], %66 {strides = array<i32>} : memref<8x128xf32, #tpu.memory_space<vmem>>, vector<8x128xf32>,
    %c0_46 = arith.constant 0 : index
    %c0_47 = arith.constant 0 : index
    %70 = vector.load %arg10[%c0_46, %c0_47] : memref<32x128xf32, #tpu.memory_space<vmem>>, vector<32x128xf32>
    %c1_48 = arith.constant 1 : index
    %c0_49 = arith.constant 0 : index
    %c0_50 = arith.constant 0 : index
    %71 = vector.load %arg4[%c1_48, %c0_49, %c0_50] : memref<2x128x128xf32, #tpu.memory_space<vmem>>, vector<1x128x128xf32>
    %72 = vector.shape_cast %71 : vector<1x128x128xf32> to vector<128x128xf32>
    %cst_51 = arith.constant dense<0.000000e+00> : vector<32x128xf32>
    %73 = tpu.matmul %70, %72, %cst_51 {dimension_numbers = #tpu.dot_dimension_numbers<[1], [0], [0], [1], [0, 0, 1, 1], [], []>} : vector<32x128xf32>, vector<128x128xf32>, vector<32x128xf32> -> vector<32x128xf32>
    %c3 = arith.constant 3 : index
    %c0_52 = arith.constant 0 : index
    %c0_53 = arith.constant 0 : index
    %74 = vector.load %arg7[%c3, %c0_52, %c0_53] : memref<5x1x128xf32, #tpu.memory_space<vmem>>, vector<1x1x128xf32>
    %75 = vector.shape_cast %74 : vector<1x1x128xf32> to vector<1x128xf32>
    %76 = vector.broadcast %75 : vector<1x128xf32> to vector<32x128xf32>
    %77 = arith.addf %73, %76 : vector<32x128xf32>
    %cst_54 = arith.constant 0.000000e+00 : f32
    %78 = vector.broadcast %cst_54 : f32 to vector<32x128xf32>
    %79 = arith.maximumf %77, %78 : vector<32x128xf32>
    %c0_55 = arith.constant 0 : index
    %c0_56 = arith.constant 0 : index
    %80 = vector.load %arg6[%c0_55, %c0_56] : memref<128x128xf32, #tpu.memory_space<vmem>>, vector<128x128xf32>
    %cst_57 = arith.constant dense<0.000000e+00> : vector<32x128xf32>
    %81 = tpu.matmul %79, %80, %cst_57 {dimension_numbers = #tpu.dot_dimension_numbers<[1], [0], [0], [1], [0, 0, 1, 1], [], []>} : vector<32x128xf32>, vector<128x128xf32>, vector<32x128xf32> -> vector<32x128xf32>
    %c4 = arith.constant 4 : index
    %c0_58 = arith.constant 0 : index
    %c0_59 = arith.constant 0 : index
    %82 = vector.load %arg7[%c4, %c0_58, %c0_59] : memref<5x1x128xf32, #tpu.memory_space<vmem>>, vector<1x1x128xf32>
    %83 = vector.shape_cast %82 : vector<1x1x128xf32> to vector<1x128xf32>
    %84 = vector.broadcast %83 : vector<1x128xf32> to vector<32x128xf32>
    %85 = arith.addf %81, %84 : vector<32x128xf32>
    %86 = vector.shape_cast %85 : vector<32x128xf32> to vector<4x8x128xf32>
    %c0_60 = arith.constant 0 : index
    %c0_61 = arith.constant 0 : index
    %c0_62 = arith.constant 0 : index
    %87 = vector.load %arg8[%c0_60, %c0_61, %c0_62] : memref<4x8x128xf32, #tpu.memory_space<vmem>>, vector<4x8x128xf32>
    tpu.vector_store %arg8[%c0_60, %c0_61, %c0_62], %86 {strides = array<i32>} : memref<4x8x128xf32, #tpu.memory_space<vmem>>, vector<4x8x128xf32>,
    return
  }
  func.func @transform_0(%arg0: i32, %arg1: i32) -> (i32, i32, i32) {
    %c0_i32 = arith.constant 0 : i32
    %c0_i32_0 = arith.constant 0 : i32
    return %arg1, %arg0, %c0_i32 : i32, i32, i32
  }
  func.func @transform_1(%arg0: i32, %arg1: i32) -> (i32, i32) {
    %c0_i32 = arith.constant 0 : i32
    %c0_i32_0 = arith.constant 0 : i32
    %c0_i32_1 = arith.constant 0 : i32
    return %c0_i32, %c0_i32_0 : i32, i32
  }
  func.func @transform_2(%arg0: i32, %arg1: i32) -> (i32, i32, i32) {
    %c0_i32 = arith.constant 0 : i32
    %c0_i32_0 = arith.constant 0 : i32
    %c0_i32_1 = arith.constant 0 : i32
    %c0_i32_2 = arith.constant 0 : i32
    return %c0_i32, %c0_i32_0, %c0_i32_1 : i32, i32, i32
  }
  func.func @transform_3(%arg0: i32, %arg1: i32) -> (i32, i32) {
    %c0_i32 = arith.constant 0 : i32
    %c0_i32_0 = arith.constant 0 : i32
    %c0_i32_1 = arith.constant 0 : i32
    return %c0_i32, %c0_i32_0 : i32, i32
  }
  func.func @transform_4(%arg0: i32, %arg1: i32) -> (i32, i32) {
    %c0_i32 = arith.constant 0 : i32
    %c0_i32_0 = arith.constant 0 : i32
    %c0_i32_1 = arith.constant 0 : i32
    return %c0_i32, %c0_i32_0 : i32, i32
  }
  func.func @transform_5(%arg0: i32, %arg1: i32) -> (i32, i32, i32) {
    %c0_i32 = arith.constant 0 : i32
    %c0_i32_0 = arith.constant 0 : i32
    %c0_i32_1 = arith.constant 0 : i32
    %c0_i32_2 = arith.constant 0 : i32
    return %c0_i32, %c0_i32_0, %c0_i32_1 : i32, i32, i32
  }
  func.func @transform_6(%arg0: i32, %arg1: i32) -> (i32, i32, i32) {
    %c0_i32 = arith.constant 0 : i32
    %c0_i32_0 = arith.constant 0 : i32
    return %arg1, %arg0, %c0_i32 : i32, i32, i32
  }
}

module attributes {stable_mosaic.version = 11 : i64} {
  func.func @_rnn_kernel(%arg0: i32, %arg1: i32, %arg2: memref<4x8x128xf32, #tpu.memory_space<vmem>>, %arg3: memref<128x128xf32, #tpu.memory_space<vmem>>, %arg4: memref<2x128x128xf32, #tpu.memory_space<vmem>>, %arg5: memref<128x128xf32, #tpu.memory_space<vmem>>, %arg6: memref<128x128xf32, #tpu.memory_space<vmem>>, %arg7: memref<5x1x128xf32, #tpu.memory_space<vmem>>, %arg8: memref<4x8x128xf32, #tpu.memory_space<vmem>>, %arg9: memref<8x128xf32, #tpu.memory_space<vmem>>, %arg10: memref<32x128xf32, #tpu.memory_space<vmem>>) attributes {dimension_semantics = [#tpu.dimension_semantics<parallel>, #tpu.dimension_semantics<arbitrary>], iteration_bounds = array<i64: 1, 2>, scalar_prefetch = 0 : i64, scratch_operands = 2 : i64, tpu.core_type = #tpu.core_type<tc>, window_params = [{transform_indices = @transform_0, window_bounds = array<i64: 4, 8, 128>}, {pipeline_mode = #tpu.pipeline_mode<synchronous>, transform_indices = @transform_1, window_bounds = array<i64: 128, 128>}, {pipeline_mode = #tpu.pipeline_mode<synchronous>, transform_indices = @transform_2, window_bounds = array<i64: 2, 128, 128>}, {pipeline_mode = #tpu.pipeline_mode<synchronous>, transform_indices = @transform_3, window_bounds = array<i64: 128, 128>}, {pipeline_mode = #tpu.pipeline_mode<synchronous>, transform_indices = @transform_4, window_bounds = array<i64: 128, 128>}, {pipeline_mode = #tpu.pipeline_mode<synchronous>, transform_indices = @transform_5, window_bounds = array<i64: 5, 1, 128>}, {transform_indices = @transform_6, window_bounds = array<i64: 4, 8, 128>}]} {
    %c0_i32 = arith.constant 0 : i32
    %0 = arith.cmpi eq, %arg1, %c0_i32 : i32
    %1 = arith.extui %0 : i1 to i32
    %c0_i32_0 = arith.constant 0 : i32
    %2 = arith.cmpi ne, %1, %c0_i32_0 : i32
    scf.if %2 {
      %cst_63 = arith.constant 0.000000e+00 : f32
      %88 = vector.broadcast %cst_63 : f32 to vector<8x128xf32>
      %c0_64 = arith.constant 0 : index
      %c0_65 = arith.constant 0 : index
      %89 = vector.load %arg9[%c0_64, %c0_65] : memref<8x128xf32, #tpu.memory_space<vmem>>, vector<8x128xf32>
      tpu.vector_store %arg9[%c0_64, %c0_65], %88 {strides = array<i32>} : memref<8x128xf32, #tpu.memory_space<vmem>>, vector<8x128xf32>,
    } else {
    }
    %c0 = arith.constant 0 : index
    %c0_1 = arith.constant 0 : index
    %c0_2 = arith.constant 0 : index
    %3 = vector.load %arg2[%c0, %c0_1, %c0_2] : memref<4x8x128xf32, #tpu.memory_space<vmem>>, vector<4x8x128xf32>
    %4 = vector.shape_cast %3 : vector<4x8x128xf32> to vector<32x128xf32>
    %c0_3 = arith.constant 0 : index
    %c0_4 = arith.constant 0 : index
    %5 = vector.load %arg3[%c0_3, %c0_4] : memref<128x128xf32, #tpu.memory_space<vmem>>, vector<128x128xf32>
    %cst = arith.constant dense<0.000000e+00> : vector<32x128xf32>
    %6 = tpu.matmul %4, %5, %cst {dimension_numbers = #tpu.dot_dimension_numbers<[1], [0], [0], [1], [0, 0, 1, 1], [], []>} : vector<32x128xf32>, vector<128x128xf32>, vector<32x128xf32> -> vector<32x128xf32>
    %c0_5 = arith.constant 0 : index
    %c0_6 = arith.constant 0 : index
    %c0_7 = arith.constant 0 : index
    %7 = vector.load %arg7[%c0_5, %c0_6, %c0_7] : memref<5x1x128xf32, #tpu.memory_space<vmem>>, vector<1x1x128xf32>
    %8 = vector.shape_cast %7 : vector<1x1x128xf32> to vector<1x128xf32>
    %9 = vector.broadcast %8 : vector<1x128xf32> to vector<32x128xf32>
    %10 = arith.addf %6, %9 : vector<32x128xf32>
    %cst_8 = arith.constant 0.000000e+00 : f32
    %11 = vector.broadcast %cst_8 : f32 to vector<32x128xf32>
    %12 = arith.maximumf %10, %11 : vector<32x128xf32>
    %c0_9 = arith.constant 0 : index
    %c0_10 = arith.constant 0 : index
    %c0_11 = arith.constant 0 : index
    %13 = vector.load %arg4[%c0_9, %c0_10, %c0_11] : memref<2x128x128xf32, #tpu.memory_space<vmem>>, vector<1x128x128xf32>
    %14 = vector.shape_cast %13 : vector<1x128x128xf32> to vector<128x128xf32>
    %cst_12 = arith.constant dense<0.000000e+00> : vector<32x128xf32>
    %15 = tpu.matmul %12, %14, %cst_12 {dimension_numbers = #tpu.dot_dimension_numbers<[1], [0], [0], [1], [0, 0, 1, 1], [], []>} : vector<32x128xf32>, vector<128x128xf32>, vector<32x128xf32> -> vector<32x128xf32>
    %c1 = arith.constant 1 : index
    %c0_13 = arith.constant 0 : index
    %c0_14 = arith.constant 0 : index
    %16 = vector.load %arg7[%c1, %c0_13, %c0_14] : memref<5x1x128xf32, #tpu.memory_space<vmem>>, vector<1x1x128xf32>
    %17 = vector.shape_cast %16 : vector<1x1x128xf32> to vector<1x128xf32>
    %18 = vector.broadcast %17 : vector<1x128xf32> to vector<32x128xf32>
    %19 = arith.addf %15, %18 : vector<32x128xf32>
    %cst_15 = arith.constant 0.000000e+00 : f32
    %20 = vector.broadcast %cst_15 : f32 to vector<32x128xf32>
    %21 = arith.maximumf %19, %20 : vector<32x128xf32>
    %c2 = arith.constant 2 : index
    %c0_16 = arith.constant 0 : index
    %c0_17 = arith.constant 0 : index
    %22 = vector.load %arg7[%c2, %c0_16, %c0_17] : memref<5x1x128xf32, #tpu.memory_space<vmem>>, vector<1x1x128xf32>
    %23 = vector.shape_cast %22 : vector<1x1x128xf32> to vector<1x128xf32>
    %24 = vector.broadcast %23 : vector<1x128xf32> to vector<32x128xf32>
    %25 = arith.addf %21, %24 : vector<32x128xf32>
    %c0_18 = arith.constant 0 : index
    %c0_19 = arith.constant 0 : index
    %26 = vector.load %arg10[%c0_18, %c0_19] : memref<32x128xf32, #tpu.memory_space<vmem>>, vector<32x128xf32>
    tpu.vector_store %arg10[%c0_18, %c0_19], %25 {strides = array<i32>} : memref<32x128xf32, #tpu.memory_space<vmem>>, vector<32x128xf32>,
    %c0_20 = arith.constant 0 : index
    %c0_21 = arith.constant 0 : index
    %27 = vector.load %arg5[%c0_20, %c0_21] : memref<128x128xf32, #tpu.memory_space<vmem>>, vector<128x128xf32>
    %c0_22 = arith.constant 0 : index
    %c0_23 = arith.constant 0 : index
    %28 = vector.load %arg9[%c0_22, %c0_23] : memref<8x128xf32, #tpu.memory_space<vmem>>, vector<8x128xf32>
    %c0_i32_24 = arith.constant 0 : i32
    %c8_i32 = arith.constant 8 : i32
    %29 = arith.muli %c0_i32_24, %c8_i32 : i32
    %30 = tpu.assume_multiple %29, 8 : i32
    %31 = arith.index_cast %30 : i32 to index
    %c0_25 = arith.constant 0 : index
    %32 = vector.load %arg10[%31, %c0_25] : memref<32x128xf32, #tpu.memory_space<vmem>>, vector<8x128xf32>
    %cst_26 = arith.constant dense<0.000000e+00> : vector<8x128xf32>
    %33 = tpu.matmul %28, %27, %cst_26 {dimension_numbers = #tpu.dot_dimension_numbers<[1], [0], [0], [1], [0, 0, 1, 1], [], []>} : vector<8x128xf32>, vector<128x128xf32>, vector<8x128xf32> -> vector<8x128xf32>
    %34 = arith.addf %33, %32 : vector<8x128xf32>
    %cst_27 = arith.constant 0.000000e+00 : f32
    %35 = vector.broadcast %cst_27 : f32 to vector<8x128xf32>
    %36 = arith.maximumf %34, %35 : vector<8x128xf32>
    %37 = arith.index_cast %30 : i32 to index
    %c0_28 = arith.constant 0 : index
    %38 = vector.load %arg10[%37, %c0_28] : memref<32x128xf32, #tpu.memory_space<vmem>>, vector<8x128xf32>
    tpu.vector_store %arg10[%37, %c0_28], %36 {strides = array<i32>} : memref<32x128xf32, #tpu.memory_space<vmem>>, vector<8x128xf32>,
    %c1_i32 = arith.constant 1 : i32
    %c8_i32_29 = arith.constant 8 : i32
    %39 = arith.muli %c1_i32, %c8_i32_29 : i32
    %40 = tpu.assume_multiple %39, 8 : i32
    %41 = arith.index_cast %40 : i32 to index
    %c0_30 = arith.constant 0 : index
    %42 = vector.load %arg10[%41, %c0_30] : memref<32x128xf32, #tpu.memory_space<vmem>>, vector<8x128xf32>
    %cst_31 = arith.constant dense<0.000000e+00> : vector<8x128xf32>
    %43 = tpu.matmul %36, %27, %cst_31 {dimension_numbers = #tpu.dot_dimension_numbers<[1], [0], [0], [1], [0, 0, 1, 1], [], []>} : vector<8x128xf32>, vector<128x128xf32>, vector<8x128xf32> -> vector<8x128xf32>
    %44 = arith.addf %43, %42 : vector<8x128xf32>
    %cst_32 = arith.constant 0.000000e+00 : f32
    %45 = vector.broadcast %cst_32 : f32 to vector<8x128xf32>
    %46 = arith.maximumf %44, %45 : vector<8x128xf32>
    %47 = arith.index_cast %40 : i32 to index
    %c0_33 = arith.constant 0 : index
    %48 = vector.load %arg10[%47, %c0_33] : memref<32x128xf32, #tpu.memory_space<vmem>>, vector<8x128xf32>
    tpu.vector_store %arg10[%47, %c0_33], %46 {strides = array<i32>} : memref<32x128xf32, #tpu.memory_space<vmem>>, vector<8x128xf32>,
    %c2_i32 = arith.constant 2 : i32
    %c8_i32_34 = arith.constant 8 : i32
    %49 = arith.muli %c2_i32, %c8_i32_34 : i32
    %50 = tpu.assume_multiple %49, 8 : i32
    %51 = arith.index_cast %50 : i32 to index
    %c0_35 = arith.constant 0 : index
    %52 = vector.load %arg10[%51, %c0_35] : memref<32x128xf32, #tpu.memory_space<vmem>>, vector<8x128xf32>
    %cst_36 = arith.constant dense<0.000000e+00> : vector<8x128xf32>
    %53 = tpu.matmul %46, %27, %cst_36 {dimension_numbers = #tpu.dot_dimension_numbers<[1], [0], [0], [1], [0, 0, 1, 1], [], []>} : vector<8x128xf32>, vector<128x128xf32>, vector<8x128xf32> -> vector<8x128xf32>
    %54 = arith.addf %53, %52 : vector<8x128xf32>
    %cst_37 = arith.constant 0.000000e+00 : f32
    %55 = vector.broadcast %cst_37 : f32 to vector<8x128xf32>
    %56 = arith.maximumf %54, %55 : vector<8x128xf32>
    %57 = arith.index_cast %50 : i32 to index
    %c0_38 = arith.constant 0 : index
    %58 = vector.load %arg10[%57, %c0_38] : memref<32x128xf32, #tpu.memory_space<vmem>>, vector<8x128xf32>
    tpu.vector_store %arg10[%57, %c0_38], %56 {strides = array<i32>} : memref<32x128xf32, #tpu.memory_space<vmem>>, vector<8x128xf32>,
    %c3_i32 = arith.constant 3 : i32
    %c8_i32_39 = arith.constant 8 : i32
    %59 = arith.muli %c3_i32, %c8_i32_39 : i32
    %60 = tpu.assume_multiple %59, 8 : i32
    %61 = arith.index_cast %60 : i32 to index
    %c0_40 = arith.constant 0 : index
    %62 = vector.load %arg10[%61, %c0_40] : memref<32x128xf32, #tpu.memory_space<vmem>>, vector<8x128xf32>
    %cst_41 = arith.constant dense<0.000000e+00> : vector<8x128xf32>
    %63 = tpu.matmul %56, %27, %cst_41 {dimension_numbers = #tpu.dot_dimension_numbers<[1], [0], [0], [1], [0, 0, 1, 1], [], []>} : vector<8x128xf32>, vector<128x128xf32>, vector<8x128xf32> -> vector<8x128xf32>
    %64 = arith.addf %63, %62 : vector<8x128xf32>
    %cst_42 = arith.constant 0.000000e+00 : f32
    %65 = vector.broadcast %cst_42 : f32 to vector<8x128xf32>
    %66 = arith.maximumf %64, %65 : vector<8x128xf32>
    %67 = arith.index_cast %60 : i32 to index
    %c0_43 = arith.constant 0 : index
    %68 = vector.load %arg10[%67, %c0_43] : memref<32x128xf32, #tpu.memory_space<vmem>>, vector<8x128xf32>
    tpu.vector_store %arg10[%67, %c0_43], %66 {strides = array<i32>} : memref<32x128xf32, #tpu.memory_space<vmem>>, vector<8x128xf32>,
    %c4_i32 = arith.constant 4 : i32
    %c0_44 = arith.constant 0 : index
    %c0_45 = arith.constant 0 : index
    %69 = vector.load %arg9[%c0_44, %c0_45] : memref<8x128xf32, #tpu.memory_space<vmem>>, vector<8x128xf32>
    tpu.vector_store %arg9[%c0_44, %c0_45], %66 {strides = array<i32>} : memref<8x128xf32, #tpu.memory_space<vmem>>, vector<8x128xf32>,
    %c0_46 = arith.constant 0 : index
    %c0_47 = arith.constant 0 : index
    %70 = vector.load %arg10[%c0_46, %c0_47] : memref<32x128xf32, #tpu.memory_space<vmem>>, vector<32x128xf32>
    %c1_48 = arith.constant 1 : index
    %c0_49 = arith.constant 0 : index
    %c0_50 = arith.constant 0 : index
    %71 = vector.load %arg4[%c1_48, %c0_49, %c0_50] : memref<2x128x128xf32, #tpu.memory_space<vmem>>, vector<1x128x128xf32>
    %72 = vector.shape_cast %71 : vector<1x128x128xf32> to vector<128x128xf32>
    %cst_51 = arith.constant dense<0.000000e+00> : vector<32x128xf32>
    %73 = tpu.matmul %70, %72, %cst_51 {dimension_numbers = #tpu.dot_dimension_numbers<[1], [0], [0], [1], [0, 0, 1, 1], [], []>} : vector<32x128xf32>, vector<128x128xf32>, vector<32x128xf32> -> vector<32x128xf32>
    %c3 = arith.constant 3 : index
    %c0_52 = arith.constant 0 : index
    %c0_53 = arith.constant 0 : index
    %74 = vector.load %arg7[%c3, %c0_52, %c0_53] : memref<5x1x128xf32, #tpu.memory_space<vmem>>, vector<1x1x128xf32>
    %75 = vector.shape_cast %74 : vector<1x1x128xf32> to vector<1x128xf32>
    %76 = vector.broadcast %75 : vector<1x128xf32> to vector<32x128xf32>
    %77 = arith.addf %73, %76 : vector<32x128xf32>
    %cst_54 = arith.constant 0.000000e+00 : f32
    %78 = vector.broadcast %cst_54 : f32 to vector<32x128xf32>
    %79 = arith.maximumf %77, %78 : vector<32x128xf32>
    %c0_55 = arith.constant 0 : index
    %c0_56 = arith.constant 0 : index
    %80 = vector.load %arg6[%c0_55, %c0_56] : memref<128x128xf32, #tpu.memory_space<vmem>>, vector<128x128xf32>
    %cst_57 = arith.constant dense<0.000000e+00> : vector<32x128xf32>
    %81 = tpu.matmul %79, %80, %cst_57 {dimension_numbers = #tpu.dot_dimension_numbers<[1], [0], [0], [1], [0, 0, 1, 1], [], []>} : vector<32x128xf32>, vector<128x128xf32>, vector<32x128xf32> -> vector<32x128xf32>
    %c4 = arith.constant 4 : index
    %c0_58 = arith.constant 0 : index
    %c0_59 = arith.constant 0 : index
    %82 = vector.load %arg7[%c4, %c0_58, %c0_59] : memref<5x1x128xf32, #tpu.memory_space<vmem>>, vector<1x1x128xf32>
    %83 = vector.shape_cast %82 : vector<1x1x128xf32> to vector<1x128xf32>
    %84 = vector.broadcast %83 : vector<1x128xf32> to vector<32x128xf32>
    %85 = arith.addf %81, %84 : vector<32x128xf32>
    %86 = vector.shape_cast %85 : vector<32x128xf32> to vector<4x8x128xf32>
    %c0_60 = arith.constant 0 : index
    %c0_61 = arith.constant 0 : index
    %c0_62 = arith.constant 0 : index
    %87 = vector.load %arg8[%c0_60, %c0_61, %c0_62] : memref<4x8x128xf32, #tpu.memory_space<vmem>>, vector<4x8x128xf32>
    tpu.vector_store %arg8[%c0_60, %c0_61, %c0_62], %86 {strides = array<i32>} : memref<4x8x128xf32, #tpu.memory_space<vmem>>, vector<4x8x128xf32>,
    return
  }
  func.func @transform_0(%arg0: i32, %arg1: i32) -> (i32, i32, i32) {
    %c0_i32 = arith.constant 0 : i32
    %c0_i32_0 = arith.constant 0 : i32
    return %arg1, %arg0, %c0_i32 : i32, i32, i32
  }
  func.func @transform_1(%arg0: i32, %arg1: i32) -> (i32, i32) {
    %c0_i32 = arith.constant 0 : i32
    %c0_i32_0 = arith.constant 0 : i32
    %c0_i32_1 = arith.constant 0 : i32
    return %c0_i32, %c0_i32_0 : i32, i32
  }
  func.func @transform_2(%arg0: i32, %arg1: i32) -> (i32, i32, i32) {
    %c0_i32 = arith.constant 0 : i32
    %c0_i32_0 = arith.constant 0 : i32
    %c0_i32_1 = arith.constant 0 : i32
    %c0_i32_2 = arith.constant 0 : i32
    return %c0_i32, %c0_i32_0, %c0_i32_1 : i32, i32, i32
  }
  func.func @transform_3(%arg0: i32, %arg1: i32) -> (i32, i32) {
    %c0_i32 = arith.constant 0 : i32
    %c0_i32_0 = arith.constant 0 : i32
    %c0_i32_1 = arith.constant 0 : i32
    return %c0_i32, %c0_i32_0 : i32, i32
  }
  func.func @transform_4(%arg0: i32, %arg1: i32) -> (i32, i32) {
    %c0_i32 = arith.constant 0 : i32
    %c0_i32_0 = arith.constant 0 : i32
    %c0_i32_1 = arith.constant 0 : i32
    return %c0_i32, %c0_i32_0 : i32, i32
  }
  func.func @transform_5(%arg0: i32, %arg1: i32) -> (i32, i32, i32) {
    %c0_i32 = arith.constant 0 : i32
    %c0_i32_0 = arith.constant 0 : i32
    %c0_i32_1 = arith.constant 0 : i32
    %c0_i32_2 = arith.constant 0 : i32
    return %c0_i32, %c0_i32_0, %c0_i32_1 : i32, i32, i32
  }
  func.func @transform_6(%arg0: i32, %arg1: i32) -> (i32, i32, i32) {
    %c0_i32 = arith.constant 0 : i32
    %c0_i32_0 = arith.constant 0 : i32
    return %arg1, %arg0, %c0_i32 : i32, i32, i32
  }
}

</mosaic_0001>

<bundles_post_ra>
// kernel: tpu_custom_call.1
= control target key start
LH: loop header
LB: loop body
LE: loop exit
PB: predicated region body
PF: predicated region fallthrough
CT: control target
= control target key end

     0   :  { %s2569_s0 = inlined_call_operand.hbm [shape: f32[8,8,128], index: 0, kind: input, shape index: {}]   ;;  %s2570_s1 = inlined_call_operand.hbm [shape: f32[128,128], index: 1, kind: input, shape index: {}]   ;;  %s2571_s2 = inlined_call_operand.hbm [shape: f32[2,128,128], index: 2, kind: input, shape index: {}]   ;;  %s2572_s3 = inlined_call_operand.hbm [shape: f32[128,128], index: 3, kind: input, shape index: {}]   ;;  %s2573_s4 = inlined_call_operand.hbm [shape: f32[128,128], index: 4, kind: input, shape index: {}]   ;;  %s2574_s5 = inlined_call_operand.vmem [shape: f32[5,1,128], index: 5, kind: input, shape index: {}]   ;;  %s2575_s6 = inlined_call_operand.hbm [shape: f32[8,8,128], index: 6, kind: output, shape index: {}]  }
   0x1   :  { %2578 = sst [smem:[#allocation18_spill]] %s2570_s1 }
   0x2   :  { %2579 = sst [smem:[#allocation19_spill]] %s2571_s2 }
   0x3   :  { %11 = vsyncpa [#allocation5], 0 }
   0x4   :  { %13 = vsyncpa [#allocation5 + $0x1], 0 }
   0x5   :  { %14 = vsyncpa [#allocation8], 0 }
   0x6   :  { %15 = vsyncpa [#allocation11], 0 }
   0x7   :  { %16 = vsyncpa [#allocation6], 0 }
   0x8   :  { %18 = vsyncpa [#allocation6 + $0x1], 0  ;;  %s2134_s21 = smov 0   ;;  %s2136_s22 = smov 0  }
   0x9   :  { %s2138_s23 = smov 0   ;;  %s2140_s24 = smov 0  }
   0xa   :  { %s2142_s25 = smov 0   ;;  %s2144_s26 = smov 0  }
   0xb LB: > { %s1279_s27 = sadd.s32 4294967295, %s2084_s26   ;;  %s1280_s28 = sadd.s32 4294967294, %s2084_s26   ;;  %s2084_s26 = sphi %s2144_s26, %s24_s26   ;;  %s2080_s25 = sphi %s2142_s25, %s2598_s25   ;;  %s2076_s24 = sphi %s2140_s24, %s2597_s24   ;;  %s2072_s23 = sphi %s2138_s23, %s2596_s23   ;;  %s2068_s22 = sphi %s2136_s22, %s2595_s22   ;;  %s2064_s21 = sphi %s2134_s21, %s2594_s21  }
   0xc   : > { %p58_p0 = scmp.ne.s32.totalorder %s2068_s22, %s2064_s21  ;;  %p2168_p1 = scmp.eq.s32.totalorder %s1279_s27, 0 }
   0xd   : > { %p2172_p2 = scmp.eq.s32.totalorder %s1279_s27, 1  ;;  %p195_p3 = scmp.eq.s32.totalorder %s1280_s28, 1 }
   0xe   : > { %p2178_p4 = por %p2168_p1, %p58_p0  ;;  %p1281_p5 = scmp.ge.s32.totalorder %s2084_s26, 1 }
   0xf   : > { %p2183_p6 = por %p195_p3, %p58_p0  ;;  %p202_p7 = scmp.lt.s32.totalorder %s2084_s26, 3 }
  0x10   : > { %s2086_s10 = smov [#allocation7]   ;;  %s2087_s13 = smov [#allocation10]  }
  0x11   : > { %s2583_s8 = scalar_select %p2183_p6, 1, 0 }
  0x12   : > { %p2188_p8 = pnand %p1281_p5, %p202_p7  ;;  %s214_s11 = sshll.u32 %s2086_s10, 4  ;;  %s215_s11 = int_to_ptr.vmem [resolvable:$true] %s214_s11 }
  0x13   : > { %s240_s14 = sshll.u32 %s2087_s13, 4  ;;  %s2088_s15 = smov [#allocation9]   ;;  %s241_s14 = int_to_ptr.vmem [resolvable:$true] %s240_s14 }
  0x14   : > { %p1774_p9 = pneg %p2188_p8  ;;  %s227_s16 = sshll.u32 %s2088_s15, 4  ;;  %s228_s16 = int_to_ptr.vmem [resolvable:$true] %s227_s16 }
  0x15   : > { %s1875_s17 = scalar_lea.vmem %s215_s11, 2048  ;;  %p1883_p5 = scmp.lt.s32.totalorder %s215_s11, %s215_s11 }
  0x16   : > { %p2197_p11 = pnand %p1774_p9, %p2168_p1  ;;  %p1876_p13 = scmp.ne.s32.totalorder %s215_s11, %s1875_s17 }
  0x17   : > { %p1884_p7 = scmp.lt.s32.totalorder %s1875_s17, %s1875_s17 }
  0x18   : > { %p1866_p12 = pneg %p2197_p11 }
  0x19   : > { %p1885_p9 = por %p1884_p7, %p1883_p5 }
  0x1a   : > { %p1878_p0 = pnand %p1876_p13, %p1866_p12 }
  0x1c   : > { %p1879_p3 = pneg %p1878_p0 }
  0x1e   : > { %p1886_p10 = pnand %p1885_p9, %p1879_p3 }
  0x20   : > { %1889 = shalt.err (!%p1886_p10)
}
  0x21   : > { %s2576_s18 = smov 128   ;;  %s2577_s19 = smov 8  }
  0x22   : > { %s2586_s1 = sld [smem:[#allocation18_spill]]  ;;  %s1901_s28 = scalar_lea.vmem %s241_s14, 2048 }
  0x23   : > { %p1902_p13 = scmp.ne.s32.totalorder %s241_s14, %s1901_s28  ;;  %p1909_p3 = scmp.lt.s32.totalorder %s241_s14, %s241_s14 }
  0x24   : > { %p1910_p10 = scmp.lt.s32.totalorder %s1901_s28, %s1901_s28 }
  0x25   : > { %p1904_p0 = pnand %p1902_p13, %p1866_p12 }
  0x26   : > { %p1911_p7 = por %p1910_p10, %p1909_p3 }
  0x27   : > { %p1905_p5 = pneg %p1904_p0 }
  0x28   : > { %1777 = dma.hbm_to_vmem [thread:$0]  (!%p2197_p11), %s2586_s1, 2048, %s215_s11, [#allocation8], %s2576_s18, %s2576_s18, %s2577_s19  }
  0x29   : > { %p1912_p9 = pnand %p1911_p7, %p1905_p5 }
  0x2b   : > { %1915 = shalt.err (!%p1912_p9)
}
  0x2c   : > { %1783 = dma.hbm_to_vmem [thread:$0]  (!%p2197_p11), %s2572_s3, 2048, %s241_s14, [#allocation11], %s2576_s18, %s2576_s18, %s2577_s19  }
  0x2d   : > { %s1927_s11 = scalar_lea.vmem %s228_s16, 4096  ;;  %p1935_p3 = scmp.lt.s32.totalorder %s228_s16, %s228_s16 }
  0x2e   : > { %p1928_p6 = scmp.ne.s32.totalorder %s228_s16, %s1927_s11  ;;  %p1936_p5 = scmp.lt.s32.totalorder %s1927_s11, %s1927_s11 }
  0x30   : > { %p1930_p13 = pnand %p1928_p6, %p1866_p12  ;;  %p1937_p10 = por %p1936_p5, %p1935_p3 }
  0x32   : > { %p1931_p0 = pneg %p1930_p13 }
  0x34   : > { %p1938_p7 = pnand %p1937_p10, %p1931_p0 }
  0x36   : > { %1941 = shalt.err (!%p1938_p7)
}
  0x37   : > { %s2587_s2 = sld [smem:[#allocation19_spill]]  ;;  %s2091_s14 = smov [#allocation12]  }
  0x38   : > { %s253_s20 = sshll.u32 %s2091_s14, 4  ;;  %s254_s20 = int_to_ptr.vmem [resolvable:$true] %s253_s20 }
  0x39   : > { %s1953_s27 = scalar_lea.vmem %s254_s20, 2048  ;;  %p1961_p0 = scmp.lt.s32.totalorder %s254_s20, %s254_s20 }
  0x3a   : > { %p1954_p6 = scmp.ne.s32.totalorder %s254_s20, %s1953_s27  ;;  %p1962_p3 = scmp.lt.s32.totalorder %s1953_s27, %s1953_s27 }
  0x3c   : > { %p1956_p9 = pnand %p1954_p6, %p1866_p12  ;;  %p1963_p5 = por %p1962_p3, %p1961_p0 }
  0x3d   : > { %1780 = dma.hbm_to_vmem [thread:$0]  (!%p2197_p11), %s2587_s2, 4096, %s228_s16, [#allocation8], %s2576_s18, %s2576_s18, %s2577_s19  }
  0x3e   : > { %p1957_p13 = pneg %p1956_p9 }
  0x40   : > { %p1964_p10 = pnand %p1963_p5, %p1957_p13 }
  0x42   : > { %1967 = shalt.err (!%p1964_p10)
}
  0x43   : > { %1786 = dma.hbm_to_vmem [thread:$0]  (!%p2197_p11), %s2573_s4, 2048, %s254_s20, [#allocation11], %s2576_s18, %s2576_s18, %s2577_s19  }
  0x44   : > { %s33_s10 = sadd.s32 1, %s2080_s25  ;;  %s45_s12 = sadd.s32 1, %s2072_s23 }
  0x45   : > { %p34_p12 = scmp.ge.s32.totalorder %s33_s10, 2  ;;  %p52_p7 = scmp.ne.s32.totalorder %s2072_s23, %s2068_s22 }
  0x46   : > { %p53_p6 = scmp.eq.s32.totalorder %s2084_s26, 0  ;;  %p1799_p9 = scmp.lt.s32.totalorder %s2084_s26, 2 }
  0x47   : > { %s2600_s10 = smov (%p34_p12, %s33_s10), 0  ;;  %p2257_p0 = por %p2172_p2, %p52_p7 }
  0x48   : > { %p54_p13 = por %p53_p6, %p52_p7  ;;  %s40_s11 = ssub.s32 %s2080_s25, %s2600_s10 }
  0x49   : > { %s270_s15 = sand.u32 1, %s2072_s23   ;;  %p43_p3 = scmp.eq.s32.totalorder %s40_s11, 0 }
  0x4a   : > { %s1287_s17 = sshll.u32 %s270_s15, 5  ;;  %s1312_s14 = sshll.u32 %s2080_s25, 9 }
  0x4b   : > { %s2266_s20 = scalar_select %p43_p3, %s2072_s23, %s45_s12  }
  0x4c   : > { %s281_s28 = scalar_lea.hbm %s2569_s0, %s1312_s14  ;;  %s274_s18 = scalar_lea.vmem [#allocation4], %s1287_s17 }
  0x4d   : > { %s282_s19 = sshll.u32 %s274_s18, 4  ;;  %p2273_p11 = pnand %p1799_p9, %p54_p13  ;;  %s283_s19 = int_to_ptr.vmem [resolvable:$true] %s282_s19 }
  0x4e   : > { %s271_s1 = scalar_lea.sflag [#allocation5], %s270_s15  ;;  %s1981_s11 = scalar_lea.vmem %s283_s19, 512 }
  0x4f   : > { %p1970_p2 = pneg %p2273_p11  ;;  %p1982_p5 = scmp.ne.s32.totalorder %s283_s19, %s1981_s11 }
  0x50   : > { %s2092_s12 = smov [#allocation4]  }
  0x51   : > { %p1984_p10 = pnand %p1982_p5, %p1970_p2  ;;  %s1986_s2 = sshll.u32 %s2092_s12, 4  ;;  %s1987_s2 = int_to_ptr.vmem [resolvable:$false] %s1986_s2 }
  0x52   : > { %s1988_s14 = scalar_lea.vmem %s1987_s2, 1024  ;;  %p1989_p7 = scmp.lt.s32.totalorder %s283_s19, %s1987_s2 }
  0x53   : > { %p1985_p12 = pneg %p1984_p10  ;;  %p1990_p6 = scmp.lt.s32.totalorder %s1988_s14, %s1981_s11 }
  0x55   : > { %p1991_p3 = por %p1990_p6, %p1989_p7 }
  0x57   : > { %p1992_p9 = pnand %p1991_p3, %p1985_p12 }
  0x59   : > { %1995 = shalt.err (!%p1992_p9)
}
  0x5a   : > { %s2590_s18 = smov 8   ;;  %s2591_s17 = smov 128  }
  0x5b   : > { %1790 = dma.hbm_to_vmem [thread:$0]  (!%p2273_p11), %s281_s28, 512, %s283_s19, %s271_s1, %s2591_s17, %s2591_s17, %s2590_s18  }
  0x5c   : > { %294 = sbr.rel (%p2188_p8) target bundleno = 1551 (0x60f), region = 44  ;;  %s2287_s15 = sand.u32 (!%p2188_p8), 1, %s2068_s22  }
  0x5d   : > { %s1291_s2 = sshll.u32 (!%p2188_p8), %s2287_s15, 5  ;;  %s297_s27 = scalar_lea.sflag (!%p2188_p8), [#allocation5], %s2287_s15 }
  0x5e   : > { %s2291_s16 = scalar_lea.vmem (!%p2188_p8), [#allocation4], %s1291_s2 }
  0x61   : > { %2047 = dma.done.wait (%p2178_p4), %s297_s27, 512  }
  0x62   : > { %2049 = vsyncadd (%p2178_p4), %s297_s27, 4294966784 }
  0x63   : > { %2051 = dma.done.wait (%p2168_p1), [#allocation8], 6144  }
  0x64   : > { %2053 = vsyncadd (%p2168_p1), [#allocation8], 4294961152 }
  0x65   : > { %2055 = dma.done.wait (%p2168_p1), [#allocation11], 4096  }
  0x66   : > { %2057 = vsyncadd (%p2168_p1), [#allocation11], 4294963200  ;;  %s2305_s1 = scalar_lea.vmem [#allocation13], %s1291_s2  ;;  %p1297_p8 = scmp.ne.s32.totalorder %s2076_s24, 0 }
  0x68   : > { %350 = sbr.rel (%p1297_p8) target bundleno = 111 (0x6f), region = 68 }
  0x6d   : > { %v2093_v0 = vmov 0.0  }
  0x6e   : > { %351 = vst [vmem:[#allocation2] sm:$0xff] %v2093_v0 }
  0x6f PF: > { %v371_v1 = vld [vmem:[#allocation7 + $0x78] sm:$0xff]  ;;  %v370_v2 = vld [vmem:[#allocation7 + $0x70] sm:$0xff]  ;;  %v369_v3 = vld [vmem:[#allocation7 + $0x68] sm:$0xff]  ;;  %v2094_v32 = vmov 0.0   ;;  %vm2095_vm0 = vmmov 0   ;;  %s1313_s17 = sshll.u32 %s2076_s24, 9 }
  0x70   : > { %1462 = vmatprep.subr.mxu0 %v371_v1  ;;  %v368_v4 = vld [vmem:[#allocation7 + $0x60] sm:$0xff]  ;;  %v367_v6 = vld [vmem:[#allocation7 + $0x58] sm:$0xff]  ;;  %v482_v8 = vld [vmem:[#allocation9 + $0x70] sm:$0xff]  ;;  %s1156_s2 = sshll.u32 %s2305_s1, 4  ;;  %s2517_s29 = scalar_lea.hbm %s2575_s6, %s1313_s17  ;;  %s2519_s2 = int_to_ptr.vmem [resolvable:$true] %s1156_s2 }
  0x71   : > { %1463 = vmatpush3.msra.mxu0 %v371_v1  ;;  %v352_v5 = vld [vmem:[%s2291_s16] sm:$0xff]  ;;  %v483_v7 = vld [vmem:[#allocation9 + $0x78] sm:$0xff]  ;;  %v366_v9 = vld [vmem:[#allocation7 + $0x50] sm:$0xff]  ;;  %s1142_s7 = scalar_lea.sflag [#allocation6], %s2287_s15  ;;  %s1996_s9 = scalar_lea.vmem %s2519_s2, 512 }
  0x72   : > { %1464 = vmatprep.subr.mxu0 %v370_v2  ;;  %1494 = vmatprep.mubr.f32.mxu0 %v352_v5  ;;  %v481_v10 = vld [vmem:[#allocation9 + $0x68] sm:$0xff]  ;;  %v480_v12 = vld [vmem:[#allocation9 + $0x60] sm:$0xff]  ;;  %v479_v14 = vld [vmem:[#allocation9 + $0x58] sm:$0xff]  ;;  %p1997_p1 = scmp.ne.s32.totalorder %s2519_s2, %s1996_s9  ;;  %s2096_s24 = smov [#allocation13]  }
  0x73   : > { %1465 = vmatpush3.msra.mxu0 %v370_v2  ;;  %1500 = vmatprep.subr.mxu1 %v483_v7  ;;  %v365_v11 = vld [vmem:[#allocation7 + $0x48] sm:$0xff]  ;;  %v364_v13 = vld [vmem:[#allocation7 + $0x40] sm:$0xff]  ;;  %v363_v15 = vld [vmem:[#allocation7 + $0x38] sm:$0xff]  ;;  %s2000_s19 = sshll.u32 %s2096_s24, 4  ;;  %s2001_s19 = int_to_ptr.vmem [resolvable:$false] %s2000_s19 }
  0x74   : > { %1466 = vmatprep.subr.mxu0 %v369_v3  ;;  %1501 = vmatpush3.msra.mxu1 %v483_v7  ;;  %v478_v16 = vld [vmem:[#allocation9 + $0x50] sm:$0xff]  ;;  %v477_v18 = vld [vmem:[#allocation9 + $0x48] sm:$0xff]  ;;  %v476_v20 = vld [vmem:[#allocation9 + $0x40] sm:$0xff]  ;;  %p1998_p4 = pnand %p1997_p1, %p2257_p0  ;;  %s2002_s28 = scalar_lea.vmem %s2001_s19, 1024 }
  0x75   : > { %1467 = vmatpush3.msra.mxu0 %v369_v3  ;;  %1502 = vmatprep.subr.mxu1 %v482_v8  ;;  %v362_v17 = vld [vmem:[#allocation7 + $0x30] sm:$0xff]  ;;  %v361_v19 = vld [vmem:[#allocation7 + $0x28] sm:$0xff]  ;;  %v360_v21 = vld [vmem:[#allocation7 + $0x20] sm:$0xff]  ;;  %p2003_p11 = scmp.lt.s32.totalorder %s2519_s2, %s2001_s19  ;;  %p2004_p2 = scmp.lt.s32.totalorder %s2002_s28, %s1996_s9 }
  0x76   : > { %1468 = vmatprep.subr.mxu0 %v368_v4  ;;  %1503 = vmatpush3.msra.mxu1 %v482_v8  ;;  %v475_v22 = vld [vmem:[#allocation9 + $0x38] sm:$0xff]  ;;  %v474_v24 = vld [vmem:[#allocation9 + $0x30] sm:$0xff]  ;;  %v473_v26 = vld [vmem:[#allocation9 + $0x28] sm:$0xff]  ;;  %p1999_p13 = pneg %p1998_p4 }
  0x77   : > { %1469 = vmatpush3.msra.mxu0 %v368_v4  ;;  %1504 = vmatprep.subr.mxu1 %v481_v10  ;;  %v359_v23 = vld [vmem:[#allocation7 + $0x18] sm:$0xff]  ;;  %v358_v25 = vld [vmem:[#allocation7 + $0x10] sm:$0xff]  ;;  %v357_v27 = vld [vmem:[#allocation7 + $0x8] sm:$0xff]  ;;  %p2005_p5 = por %p2004_p2, %p2003_p11 }
  0x78   : > { %1470 = vmatprep.subr.mxu0 %v367_v6  ;;  %1505 = vmatpush3.msra.mxu1 %v481_v10  ;;  %v472_v28 = vld [vmem:[#allocation9 + $0x20] sm:$0xff]  ;;  %v353_v30 = vld [vmem:[%s2291_s16 + $0x8] sm:$0xff]  ;;  %v2310_v31 = vld [vmem:[#allocation10 + $0x78] sm:$0xff] }
  0x79   : > { %1471 = vmatpush3.msra.mxu0 %v367_v6  ;;  %1506 = vmatprep.subr.mxu1 %v480_v12  ;;  %v356_v29 = vld [vmem:[#allocation7] sm:$0xff]  ;;  %v2313_v33 = vld [vmem:[#allocation10 + $0x70] sm:$0xff]  ;;  %v2317_v34 = vld [vmem:[#allocation10 + $0x68] sm:$0xff]  ;;  %p2006_p10 = pnand %p2005_p5, %p1999_p13 }
  0x7a   : > { %1472 = vmatprep.subr.mxu0 %v366_v9  ;;  %1507 = vmatpush3.msra.mxu1 %v480_v12  ;;  %v2321_v35 = vld [vmem:[#allocation10 + $0x60] sm:$0xff]  ;;  %v2325_v36 = vld [vmem:[#allocation10 + $0x58] sm:$0xff]  ;;  %v2329_v37 = vld [vmem:[#allocation10 + $0x50] sm:$0xff] }
  0x7b   : > { %1473 = vmatpush3.msra.mxu0 %v366_v9  ;;  %1508 = vmatprep.subr.mxu1 %v479_v14  ;;  %v2333_v38 = vld [vmem:[#allocation10 + $0x48] sm:$0xff]  ;;  %v2337_v39 = vld [vmem:[#allocation10 + $0x40] sm:$0xff]  ;;  %v2341_v40 = vld [vmem:[#allocation10 + $0x38] sm:$0xff] }
  0x7c   : > { %1474 = vmatprep.subr.mxu0 %v365_v11  ;;  %1509 = vmatpush3.msra.mxu1 %v479_v14  ;;  %v471_v41 = vld [vmem:[#allocation9 + $0x18] sm:$0xff]  ;;  %v2347_v42 = vld [vmem:[#allocation10 + $0x30] sm:$0xff]  ;;  %v2352_v45 = vld [vmem:[#allocation10 + $0x28] sm:$0xff] }
  0x7d   : > { %1475 = vmatpush3.msra.mxu0 %v365_v11  ;;  %1510 = vmatprep.subr.mxu1 %v478_v16  ;;  %v470_v43 = vld [vmem:[#allocation9 + $0x10] sm:$0xff]  ;;  %v355_v46 = vld [vmem:[%s2291_s16 + $0x18] sm:$0xff]  ;;  %v469_v47 = vld [vmem:[#allocation9 + $0x8] sm:$0xff] }
  0x7e   : > { %1476 = vmatprep.subr.mxu0 %v364_v13  ;;  %1511 = vmatpush3.msra.mxu1 %v478_v16  ;;  %v354_v44 = vld [vmem:[%s2291_s16 + $0x10] sm:$0xff]  ;;  %v2355_v48 = vld [vmem:[#allocation10 + $0x20] sm:$0xff]  ;;  %v2360_v50 = vld [vmem:[#allocation10 + $0x18] sm:$0xff] }
  0x7f   : > { %1477 = vmatpush3.msra.mxu0 %v364_v13  ;;  %1512 = vmatprep.subr.mxu1 %v477_v18  ;;  %v468_v49 = vld [vmem:[#allocation9] sm:$0xff]  ;;  %v2364_v51 = vld [vmem:[#allocation10 + $0x10] sm:$0xff]  ;;  %v2367_v52 = vld [vmem:[#allocation10 + $0x8] sm:$0xff] }
  0x80   : > { %1478 = vmatprep.subr.mxu0 %v363_v15  ;;  %1513 = vmatpush3.msra.mxu1 %v477_v18  ;;  %v2374_v53 = vld [vmem:[#allocation10] sm:$0xff]  ;;  %v613_v54 = vld [vmem:[#allocation2] sm:$0xff] }
  0x81   : > { %1479 = vmatpush3.msra.mxu0 %v363_v15  ;;  %1514 = vmatprep.subr.mxu1 %v476_v20  ;;  %v1298_v55 = vld [vmem:[%s2574_s5] ss:$0 sm:$0xff]  ;;  %v2453_v7 = vld [vmem:[%s2574_s5 + $0x1] ss:$0 sm:$0xff]  ;;  %v2459_v11 = vld [vmem:[%s2574_s5 + $0x2] ss:$0 sm:$0xff] }
  0x82   : > { %1480 = vmatprep.subr.mxu0 %v362_v17  ;;  %1515 = vmatpush3.msra.mxu1 %v476_v20  ;;  %v930_v15 = vld [vmem:[#allocation9 + $0xf8] sm:$0xff] }
  0x83   : > { %1481 = vmatpush3.msra.mxu0 %v362_v17  ;;  %1516 = vmatprep.subr.mxu1 %v475_v22 }
  0x84   : > { %1482 = vmatprep.subr.mxu0 %v361_v19  ;;  %1517 = vmatpush3.msra.mxu1 %v475_v22 }
  0x85   : > { %1483 = vmatpush3.msra.mxu0 %v361_v19  ;;  %1518 = vmatprep.subr.mxu1 %v474_v24 }
  0x86   : > { %1484 = vmatprep.subr.mxu0 %v360_v21  ;;  %1519 = vmatpush3.msra.mxu1 %v474_v24 }
  0x87   : > { %1485 = vmatpush3.msra.mxu0 %v360_v21  ;;  %1520 = vmatprep.subr.mxu1 %v473_v26 }
  0x88   : > { %1486 = vmatprep.subr.mxu0 %v359_v23  ;;  %1521 = vmatpush3.msra.mxu1 %v473_v26  ;;  %v928_v26 = vld [vmem:[#allocation9 + $0xe8] sm:$0xff] }
  0x89   : > { %1487 = vmatpush3.msra.mxu0 %v359_v23  ;;  %1522 = vmatprep.subr.mxu1 %v472_v28 }
  0x8a   : > { %1488 = vmatprep.subr.mxu0 %v358_v25  ;;  %1523 = vmatpush3.msra.mxu1 %v472_v28  ;;  %v926_v28 = vld [vmem:[#allocation9 + $0xd8] sm:$0xff] }
  0x8b   : > { %1489 = vmatpush3.msra.mxu0 %v358_v25  ;;  %1524 = vmatprep.subr.mxu1 %v471_v41  ;;  %v929_v25 = vld [vmem:[#allocation9 + $0xf0] sm:$0xff] }
  0x8c   : > { %1490 = vmatprep.subr.mxu0 %v357_v27  ;;  %1525 = vmatpush3.msra.mxu1 %v471_v41 }
  0x8d   : > { %1491 = vmatpush3.msra.mxu0 %v357_v27  ;;  %1526 = vmatprep.subr.mxu1 %v470_v43  ;;  %v927_v27 = vld [vmem:[#allocation9 + $0xe0] sm:$0xff] }
  0x8e   : > { %1492 = vmatprep.subr.mxu0 %v356_v29  ;;  %1527 = vmatpush3.msra.mxu1 %v470_v43 }
  0x8f   : > { %1493 = vmatpush3.msra.mxu0 %v356_v29  ;;  %1528 = vmatprep.subr.mxu1 %v469_v47  ;;  %v925_v29 = vld [vmem:[#allocation9 + $0xd0] sm:$0xff] }
  0x90   : > { %1495 = vmatmul.mubr.f32.vlgmr.msra.gmra.mxu0 %v353_v30  ;;  %1538 = vmatprep.subr.mxu0 %v2094_v32  ;;  %v924_v30 = vld [vmem:[#allocation9 + $0xc8] sm:$0xff] }
  0x91   : > { %1539 = vmatpush3.msra.mxu0 %v2310_v31  ;;  %1497 = vmatprep.mubr.f32.mxu0 %v354_v44 }
  0x92   : > { %1540 = vmatprep.subr.mxu0 %v2094_v32  ;;  %1529 = vmatpush3.msra.mxu1 %v469_v47 }
  0x93   : > { %1541 = vmatpush3.msra.mxu0 %v2313_v33  ;;  %1530 = vmatprep.subr.mxu1 %v468_v49 }
  0x94   : > { %1542 = vmatprep.subr.mxu0 %v2094_v32  ;;  %1498 = vmatmul.mubr.f32.gmra.mxu0 %v355_v46 }
  0x95   : > { %1543 = vmatpush3.msra.mxu0 %v2317_v34  ;;  %1531 = vmatpush3.msra.mxu1 %v468_v49  ;;  %v1041_v49 = vld [vmem:[#allocation12 + $0x68] sm:$0xff] }
  0x96   : > { %1544 = vmatprep.subr.mxu0 %v2094_v32  ;;  %1570 = vmatprep.mubr.msk.f32.mxu0 %vm2095_vm0, %v2094_v32 }
  0x97   : > { %1545 = vmatpush3.msra.mxu0 %v2321_v35  ;;  %1573 = vmatprep.subr.mxu1 %v2094_v32 }
  0x98   : > { %1546 = vmatprep.subr.mxu0 %v2094_v32 }
  0x99   : > { %1547 = vmatpush3.msra.mxu0 %v2325_v36 }
  0x9a   : > { %1548 = vmatprep.subr.mxu0 %v2094_v32 }
  0x9b   : > { %1549 = vmatpush3.msra.mxu0 %v2329_v37 }
  0x9c   : > { %1550 = vmatprep.subr.mxu0 %v2094_v32 }
  0x9d   : > { %1551 = vmatpush3.msra.mxu0 %v2333_v38 }
  0x9e   : > { %1552 = vmatprep.subr.mxu0 %v2094_v32 }
  0x9f   : > { %1553 = vmatpush3.msra.mxu0 %v2337_v39 }
  0xa0   : > { %1554 = vmatprep.subr.mxu0 %v2094_v32 }
  0xa1   : > { %1555 = vmatpush3.msra.mxu0 %v2341_v40 }
  0xa2   : > { %1556 = vmatprep.subr.mxu0 %v2094_v32 }
  0xa3   : > { %1557 = vmatpush3.msra.mxu0 %v2347_v42 }
  0xa4   : > { %1558 = vmatprep.subr.mxu0 %v2094_v32 }
  0xa5   : > { %1559 = vmatpush3.msra.mxu0 %v2352_v45 }
  0xa6   : > { %1560 = vmatprep.subr.mxu0 %v2094_v32 }
  0xa7   : > { %1561 = vmatpush3.msra.mxu0 %v2355_v48 }
  0xa8   : > { %1562 = vmatprep.subr.mxu0 %v2094_v32 }
  0xa9   : > { %1563 = vmatpush3.msra.mxu0 %v2360_v50 }
  0xaa   : > { %1564 = vmatprep.subr.mxu0 %v2094_v32 }
  0xab   : > { %1565 = vmatpush3.msra.mxu0 %v2364_v51 }
  0xac   : > { %1566 = vmatprep.subr.mxu0 %v2094_v32 }
  0xad   : > { %1567 = vmatpush3.msra.mxu0 %v2367_v52 }
  0xae   : > { %1568 = vmatprep.subr.mxu0 %v2094_v32 }
  0xaf   : > { %1569 = vmatpush3.msra.mxu0 %v2374_v53 }
  0xb0   : > { %1571 = vmatmul.mubr.f32.vlgmr.msra.gmra.mxu0 %v613_v54  ;;  %1608 = vmatprep.subr.mxu0 %v2094_v32  ;;  %v1036_v54 = vld [vmem:[#allocation12 + $0x40] sm:$0xff] }
  0xb1   : > { %1609 = vmatpush3.msra.mxu0 %v2310_v31  ;;  %1640 = vmatprep.mubr.msk.f32.mxu0 %vm2095_vm0, %v2094_v32 }
  0xb2   : > { %1610 = vmatprep.subr.mxu0 %v2094_v32 }
  0xb3   : > { %1611 = vmatpush3.msra.mxu0 %v2313_v33 }
  0xb4   : > { %1612 = vmatprep.subr.mxu0 %v2094_v32 }
  0xb5   : > { %1613 = vmatpush3.msra.mxu0 %v2317_v34 }
  0xb6   : > { %1614 = vmatprep.subr.mxu0 %v2094_v32 }
  0xb7   : > { %1615 = vmatpush3.msra.mxu0 %v2321_v35 }
  0xb8   : > { %1616 = vmatprep.subr.mxu0 %v2094_v32 }
  0xb9   : > { %1617 = vmatpush3.msra.mxu0 %v2325_v36 }
  0xba   : > { %1618 = vmatprep.subr.mxu0 %v2094_v32 }
  0xbb   : > { %1619 = vmatpush3.msra.mxu0 %v2329_v37 }
  0xbc   : > { %1620 = vmatprep.subr.mxu0 %v2094_v32 }
  0xbd   : > { %1621 = vmatpush3.msra.mxu0 %v2333_v38 }
  0xbe   : > { %1622 = vmatprep.subr.mxu0 %v2094_v32 }
  0xbf   : > { %1623 = vmatpush3.msra.mxu0 %v2337_v39 }
  0xc0   : > { %1624 = vmatprep.subr.mxu0 %v2094_v32 }
  0xc1   : > { %1625 = vmatpush3.msra.mxu0 %v2341_v40 }
  0xc2   : > { %1626 = vmatprep.subr.mxu0 %v2094_v32 }
  0xc3   : > { %1627 = vmatpush3.msra.mxu0 %v2347_v42 }
  0xc4   : > { %1628 = vmatprep.subr.mxu0 %v2094_v32 }
  0xc5   : > { %1629 = vmatpush3.msra.mxu0 %v2352_v45 }
  0xc6   : > { %1630 = vmatprep.subr.mxu0 %v2094_v32 }
  0xc7   : > { %1631 = vmatpush3.msra.mxu0 %v2355_v48 }
  0xc8   : > { %1632 = vmatprep.subr.mxu0 %v2094_v32 }
  0xc9   : > { %1633 = vmatpush3.msra.mxu0 %v2360_v50 }
  0xca   : > { %1634 = vmatprep.subr.mxu0 %v2094_v32 }
  0xcb   : > { %1635 = vmatpush3.msra.mxu0 %v2364_v51 }
  0xcc   : > { %1636 = vmatprep.subr.mxu0 %v2094_v32 }
  0xcd   : > { %1637 = vmatpush3.msra.mxu0 %v2367_v52 }
  0xce   : > { %1638 = vmatprep.subr.mxu0 %v2094_v32 }
  0xcf   : > { %1639 = vmatpush3.msra.mxu0 %v2374_v53 }
  0xd0   : > { %1678 = vmatprep.subr.mxu0 %v930_v15 }
 0x150   : > { %v1496_v56 = vpop.f32.mrf.mxu0 }
 0x151   : > { %v451_v57 = vadd.f32 %v1496_v56, %v1298_v55  ;;  %v1034_v56 = vld [vmem:[#allocation12 + $0x30] sm:$0xff] }
 0x152   : > { %v445_v58 = vpop.f32.mrf.mxu0 }
 0x153   : > { %v446_v59 = vadd.f32 %v1298_v55, %v445_v58  ;;  %v465_v61 = vmax.f32 %v451_v57, 0.0  ;;  %v1033_v57 = vld [vmem:[#allocation12 + $0x28] sm:$0xff]  ;;  %v1032_v58 = vld [vmem:[#allocation12 + $0x20] sm:$0xff] }
 0x154   : > { %v1499_v62 = vpop.f32.mrf.mxu0 }
 0x155   : > { %v464_v60 = vmax.f32 %v446_v59, 0.0  ;;  %v461_v63 = vadd.f32 %v1499_v62, %v1298_v55  ;;  %v1031_v59 = vld [vmem:[#allocation12 + $0x18] sm:$0xff] }
 0x156   : > { %v455_v0 = vpop.f32.mrf.mxu0  ;;  %v1304_v62 = vld [vmem:[%s2574_s5 + $0x3] ss:$0 sm:$0xff] }
 0x157   : > { %1532 = vmatprep.mubr.f32.mxu1 %v464_v60  ;;  %v456_v1 = vadd.f32 %v1298_v55, %v455_v0  ;;  %v467_v2 = vmax.f32 %v461_v63, 0.0  ;;  %v1035_v55 = vld [vmem:[#allocation12 + $0x38] sm:$0xff]  ;;  %v1030_v60 = vld [vmem:[#allocation12 + $0x10] sm:$0xff]  ;;  %v1028_v0 = vld [vmem:[#allocation12] sm:$0xff] }
 0x158   : > { %1533 = vmatmul.mubr.f32.vlgmr.msra.gmra.mxu1 %v465_v61  ;;  %v1029_v61 = vld [vmem:[#allocation12 + $0x8] sm:$0xff] }
 0x159   : > { %1574 = vmatpush3.msra.mxu1 %v2310_v31  ;;  %v466_v3 = vmax.f32 %v456_v1, 0.0 }
 0x15a   : > { %1575 = vmatprep.subr.mxu1 %v2094_v32 }
 0x15b   : > { %1576 = vmatpush3.msra.mxu1 %v2313_v33  ;;  %1535 = vmatprep.mubr.f32.mxu1 %v466_v3 }
 0x15c   : > { %1577 = vmatprep.subr.mxu1 %v2094_v32  ;;  %1536 = vmatmul.mubr.f32.gmra.mxu1 %v467_v2 }
 0x15d   : > { %1578 = vmatpush3.msra.mxu1 %v2317_v34  ;;  %1605 = vmatprep.mubr.msk.f32.mxu1 %vm2095_vm0, %v2094_v32 }
 0x15e   : > { %1579 = vmatprep.subr.mxu1 %v2094_v32 }
 0x15f   : > { %1580 = vmatpush3.msra.mxu1 %v2321_v35 }
 0x160   : > { %1581 = vmatprep.subr.mxu1 %v2094_v32 }
 0x161   : > { %1582 = vmatpush3.msra.mxu1 %v2325_v36 }
 0x162   : > { %1583 = vmatprep.subr.mxu1 %v2094_v32 }
 0x163   : > { %1584 = vmatpush3.msra.mxu1 %v2329_v37 }
 0x164   : > { %1585 = vmatprep.subr.mxu1 %v2094_v32 }
 0x165   : > { %1586 = vmatpush3.msra.mxu1 %v2333_v38 }
 0x166   : > { %1587 = vmatprep.subr.mxu1 %v2094_v32 }
 0x167   : > { %1588 = vmatpush3.msra.mxu1 %v2337_v39 }
 0x168   : > { %1589 = vmatprep.subr.mxu1 %v2094_v32 }
 0x169   : > { %1590 = vmatpush3.msra.mxu1 %v2341_v40 }
 0x16a   : > { %1591 = vmatprep.subr.mxu1 %v2094_v32 }
 0x16b   : > { %1592 = vmatpush3.msra.mxu1 %v2347_v42 }
 0x16c   : > { %1593 = vmatprep.subr.mxu1 %v2094_v32 }
 0x16d   : > { %1594 = vmatpush3.msra.mxu1 %v2352_v45 }
 0x16e   : > { %1595 = vmatprep.subr.mxu1 %v2094_v32 }
 0x16f   : > { %1596 = vmatpush3.msra.mxu1 %v2355_v48 }
 0x170   : > { %1597 = vmatprep.subr.mxu1 %v2094_v32  ;;  %v681_v4 = vpop.f32.mrf.mxu0 }
 0x171   : > { %1598 = vmatpush3.msra.mxu1 %v2360_v50 }
 0x172   : > { %1599 = vmatprep.subr.mxu1 %v2094_v32  ;;  %v1572_v5 = vpop.f32.mrf.mxu0 }
 0x173   : > { %1600 = vmatpush3.msra.mxu1 %v2364_v51 }
 0x174   : > { %1601 = vmatprep.subr.mxu1 %v2094_v32 }
 0x175   : > { %1602 = vmatpush3.msra.mxu1 %v2367_v52 }
 0x176   : > { %1603 = vmatprep.subr.mxu1 %v2094_v32 }
 0x177   : > { %1604 = vmatpush3.msra.mxu1 %v2374_v53 }
 0x178   : > { %1643 = vmatprep.subr.mxu1 %v2094_v32 }
 0x218   : > { %v1534_v6 = vpop.f32.mrf.mxu1 }
 0x219   : > { %v564_v16 = vadd.f32 %v1534_v6, %v2453_v7 }
 0x21a   : > { %v558_v8 = vpop.f32.mrf.mxu1 }
 0x21b   : > { %v559_v9 = vadd.f32 %v2453_v7, %v558_v8  ;;  %v578_v18 = vmax.f32 %v564_v16, 0.0 }
 0x21c   : > { %v2496_v17 = vpop.f32.mrf.mxu1 }
 0x21d   : > { %v577_v10 = vmax.f32 %v559_v9, 0.0  ;;  %v590_v20 = vadd.f32 %v2459_v11, %v578_v18  ;;  %v574_v6 = vadd.f32 %v2496_v17, %v2453_v7 }
 0x21e   : > { %v568_v19 = vpop.f32.mrf.mxu1 }
 0x21f   : > { %v589_v12 = vadd.f32 %v2459_v11, %v577_v10  ;;  %v569_v41 = vadd.f32 %v2453_v7, %v568_v19  ;;  %v580_v8 = vmax.f32 %v574_v6, 0.0 }
 0x221   : > { %v682_v13 = vadd.f32 %v681_v4, %v589_v12  ;;  %v592_v9 = vadd.f32 %v2459_v11, %v580_v8 }
 0x223   : > { %v685_v14 = vmax.f32 %v682_v13, 0.0 }
 0x225   : > { %1606 = vmatmul.mubr.f32.vlgmr.msra.gmra.mxu1 %v685_v14 }
 0x226   : > { %1644 = vmatpush3.msra.mxu1 %v2310_v31  ;;  %1675 = vmatprep.mubr.msk.f32.mxu1 %vm2095_vm0, %v2094_v32  ;;  %v923_v31 = vld [vmem:[#allocation9 + $0xc0] sm:$0xff] }
 0x227   : > { %1645 = vmatprep.subr.mxu1 %v2094_v32 }
 0x228   : > { %1646 = vmatpush3.msra.mxu1 %v2313_v33  ;;  %v921_v33 = vld [vmem:[#allocation9 + $0xb0] sm:$0xff] }
 0x229   : > { %1647 = vmatprep.subr.mxu1 %v2094_v32 }
 0x22a   : > { %1648 = vmatpush3.msra.mxu1 %v2317_v34  ;;  %v920_v34 = vld [vmem:[#allocation9 + $0xa8] sm:$0xff] }
 0x22b   : > { %1649 = vmatprep.subr.mxu1 %v2094_v32 }
 0x22c   : > { %1650 = vmatpush3.msra.mxu1 %v2321_v35  ;;  %v919_v35 = vld [vmem:[#allocation9 + $0xa0] sm:$0xff] }
 0x22d   : > { %1651 = vmatprep.subr.mxu1 %v2094_v32 }
 0x22e   : > { %1652 = vmatpush3.msra.mxu1 %v2325_v36  ;;  %v918_v36 = vld [vmem:[#allocation9 + $0x98] sm:$0xff] }
 0x22f   : > { %1653 = vmatprep.subr.mxu1 %v2094_v32 }
 0x230   : > { %1654 = vmatpush3.msra.mxu1 %v2329_v37  ;;  %v917_v37 = vld [vmem:[#allocation9 + $0x90] sm:$0xff] }
 0x231   : > { %1655 = vmatprep.subr.mxu1 %v2094_v32 }
 0x232   : > { %1656 = vmatpush3.msra.mxu1 %v2333_v38  ;;  %v916_v38 = vld [vmem:[#allocation9 + $0x88] sm:$0xff] }
 0x233   : > { %1657 = vmatprep.subr.mxu1 %v2094_v32 }
 0x234   : > { %1658 = vmatpush3.msra.mxu1 %v2337_v39  ;;  %v915_v39 = vld [vmem:[#allocation9 + $0x80] sm:$0xff] }
 0x235   : > { %1659 = vmatprep.subr.mxu1 %v2094_v32 }
 0x236   : > { %1660 = vmatpush3.msra.mxu1 %v2341_v40  ;;  %v1043_v40 = vld [vmem:[#allocation12 + $0x78] sm:$0xff] }
 0x237   : > { %1661 = vmatprep.subr.mxu1 %v2094_v32 }
 0x238   : > { %1662 = vmatpush3.msra.mxu1 %v2347_v42  ;;  %v579_v42 = vmax.f32 %v569_v41, 0.0 }
 0x239   : > { %1663 = vmatprep.subr.mxu1 %v2094_v32 }
 0x23a   : > { %1664 = vmatpush3.msra.mxu1 %v2352_v45  ;;  %v591_v43 = vadd.f32 %v2459_v11, %v579_v42 }
 0x23b   : > { %1665 = vmatprep.subr.mxu1 %v2094_v32 }
 0x23c   : > { %1666 = vmatpush3.msra.mxu1 %v2355_v48  ;;  %v1042_v48 = vld [vmem:[#allocation12 + $0x70] sm:$0xff] }
 0x23d   : > { %1667 = vmatprep.subr.mxu1 %v2094_v32 }
 0x23e   : > { %1668 = vmatpush3.msra.mxu1 %v2360_v50  ;;  %v1040_v50 = vld [vmem:[#allocation12 + $0x60] sm:$0xff] }
 0x23f   : > { %1669 = vmatprep.subr.mxu1 %v2094_v32 }
 0x240   : > { %1670 = vmatpush3.msra.mxu1 %v2364_v51  ;;  %v1039_v51 = vld [vmem:[#allocation12 + $0x58] sm:$0xff] }
 0x241   : > { %1671 = vmatprep.subr.mxu1 %v2094_v32 }
 0x242   : > { %1672 = vmatpush3.msra.mxu1 %v2367_v52  ;;  %v1038_v52 = vld [vmem:[#allocation12 + $0x50] sm:$0xff] }
 0x243   : > { %1673 = vmatprep.subr.mxu1 %v2094_v32  ;;  %v922_v32 = vld [vmem:[#allocation9 + $0xb8] sm:$0xff] }
 0x244   : > { %1674 = vmatpush3.msra.mxu1 %v2374_v53  ;;  %v1037_v53 = vld [vmem:[#allocation12 + $0x48] sm:$0xff] }
 0x245   : > { %1716 = vmatprep.subr.mxu1 %v1043_v40 }
 0x2e5   : > { %v755_v21 = vpop.f32.mrf.mxu1 }
 0x2e6   : > { %v756_v22 = vadd.f32 %v755_v21, %v590_v20 }
 0x2e7   : > { %v1607_v23 = vpop.f32.mrf.mxu1 }
 0x2e8   : > { %v759_v24 = vmax.f32 %v756_v22, 0.0 }
 0x2ea   : > { %1641 = vmatmul.mubr.f32.vlgmr.msra.gmra.mxu0 %v759_v24 }
 0x2eb   : > { %1679 = vmatpush3.msra.mxu0 %v930_v15  ;;  %1710 = vmatprep.mubr.f32.mxu0 %v685_v14  ;;  %v1306_v15 = vld [vmem:[%s2574_s5 + $0x4] ss:$0 sm:$0xff] }
 0x2ec   : > { %1680 = vmatprep.subr.mxu0 %v929_v25 }
 0x2ed   : > { %1681 = vmatpush3.msra.mxu0 %v929_v25 }
 0x2ee   : > { %1682 = vmatprep.subr.mxu0 %v928_v26 }
 0x2ef   : > { %1683 = vmatpush3.msra.mxu0 %v928_v26 }
 0x2f0   : > { %1684 = vmatprep.subr.mxu0 %v927_v27 }
 0x2f1   : > { %1685 = vmatpush3.msra.mxu0 %v927_v27 }
 0x2f2   : > { %1686 = vmatprep.subr.mxu0 %v926_v28 }
 0x2f3   : > { %1687 = vmatpush3.msra.mxu0 %v926_v28 }
 0x2f4   : > { %1688 = vmatprep.subr.mxu0 %v925_v29 }
 0x2f5   : > { %1689 = vmatpush3.msra.mxu0 %v925_v29 }
 0x2f6   : > { %1690 = vmatprep.subr.mxu0 %v924_v30 }
 0x2f7   : > { %1691 = vmatpush3.msra.mxu0 %v924_v30 }
 0x2f8   : > { %1692 = vmatprep.subr.mxu0 %v923_v31 }
 0x2f9   : > { %1693 = vmatpush3.msra.mxu0 %v923_v31 }
 0x2fa   : > { %1694 = vmatprep.subr.mxu0 %v922_v32 }
 0x2fb   : > { %1695 = vmatpush3.msra.mxu0 %v922_v32 }
 0x2fc   : > { %1696 = vmatprep.subr.mxu0 %v921_v33 }
 0x2fd   : > { %1697 = vmatpush3.msra.mxu0 %v921_v33 }
 0x2fe   : > { %1698 = vmatprep.subr.mxu0 %v920_v34 }
 0x2ff   : > { %1699 = vmatpush3.msra.mxu0 %v920_v34 }
 0x300   : > { %1700 = vmatprep.subr.mxu0 %v919_v35 }
 0x301   : > { %1701 = vmatpush3.msra.mxu0 %v919_v35 }
 0x302   : > { %1702 = vmatprep.subr.mxu0 %v918_v36 }
 0x303   : > { %1703 = vmatpush3.msra.mxu0 %v918_v36 }
 0x304   : > { %1704 = vmatprep.subr.mxu0 %v917_v37 }
 0x305   : > { %1705 = vmatpush3.msra.mxu0 %v917_v37 }
 0x306   : > { %1706 = vmatprep.subr.mxu0 %v916_v38 }
 0x307   : > { %1707 = vmatpush3.msra.mxu0 %v916_v38 }
 0x308   : > { %1708 = vmatprep.subr.mxu0 %v915_v39 }
 0x309   : > { %1709 = vmatpush3.msra.mxu0 %v915_v39 }
 0x30a   : > { %1711 = vmatmul.mubr.f32.vlgmr.msra.gmra.mxu0 %v759_v24 }
 0x3aa   : > { %v829_v44 = vpop.f32.mrf.mxu0 }
 0x3ab   : > { %v830_v45 = vadd.f32 %v829_v44, %v591_v43 }
 0x3ac   : > { %v1642_v46 = vpop.f32.mrf.mxu0 }
 0x3ad   : > { %v833_v47 = vmax.f32 %v830_v45, 0.0 }
 0x3af   : > { %1676 = vmatmul.mubr.f32.vlgmr.msra.gmra.mxu1 %v833_v47  ;;  %1713 = vmatprep.mubr.f32.mxu0 %v833_v47 }
 0x3b0   : > { %1717 = vmatpush3.msra.mxu1 %v1043_v40 }
 0x3b1   : > { %1718 = vmatprep.subr.mxu1 %v1042_v48 }
 0x3b2   : > { %1719 = vmatpush3.msra.mxu1 %v1042_v48 }
 0x3b3   : > { %1720 = vmatprep.subr.mxu1 %v1041_v49 }
 0x3b4   : > { %1721 = vmatpush3.msra.mxu1 %v1041_v49 }
 0x3b5   : > { %1722 = vmatprep.subr.mxu1 %v1040_v50 }
 0x3b6   : > { %1723 = vmatpush3.msra.mxu1 %v1040_v50 }
 0x3b7   : > { %1724 = vmatprep.subr.mxu1 %v1039_v51 }
 0x3b8   : > { %1725 = vmatpush3.msra.mxu1 %v1039_v51 }
 0x3b9   : > { %1726 = vmatprep.subr.mxu1 %v1038_v52 }
 0x3ba   : > { %1727 = vmatpush3.msra.mxu1 %v1038_v52 }
 0x3bb   : > { %1728 = vmatprep.subr.mxu1 %v1037_v53 }
 0x3bc   : > { %1729 = vmatpush3.msra.mxu1 %v1037_v53 }
 0x3bd   : > { %1730 = vmatprep.subr.mxu1 %v1036_v54 }
 0x3be   : > { %1731 = vmatpush3.msra.mxu1 %v1036_v54 }
 0x3bf   : > { %1732 = vmatprep.subr.mxu1 %v1035_v55 }
 0x3c0   : > { %1733 = vmatpush3.msra.mxu1 %v1035_v55 }
 0x3c1   : > { %1734 = vmatprep.subr.mxu1 %v1034_v56 }
 0x3c2   : > { %1735 = vmatpush3.msra.mxu1 %v1034_v56 }
 0x3c3   : > { %1736 = vmatprep.subr.mxu1 %v1033_v57 }
 0x3c4   : > { %1737 = vmatpush3.msra.mxu1 %v1033_v57 }
 0x3c5   : > { %1738 = vmatprep.subr.mxu1 %v1032_v58 }
 0x3c6   : > { %1739 = vmatpush3.msra.mxu1 %v1032_v58 }
 0x3c7   : > { %1740 = vmatprep.subr.mxu1 %v1031_v59 }
 0x3c8   : > { %1741 = vmatpush3.msra.mxu1 %v1031_v59 }
 0x3c9   : > { %1742 = vmatprep.subr.mxu1 %v1030_v60 }
 0x3ca   : > { %v1712_v63 = vpop.f32.mrf.mxu0  ;;  %1743 = vmatpush3.msra.mxu1 %v1030_v60 }
 0x3cb   : > { %1744 = vmatprep.subr.mxu1 %v1029_v61  ;;  %v1011_v1 = vadd.f32 %v1712_v63, %v1304_v62 }
 0x3cc   : > { %v1005_v2 = vpop.f32.mrf.mxu0  ;;  %1745 = vmatpush3.msra.mxu1 %v1029_v61 }
 0x3cd   : > { %v1006_v3 = vadd.f32 %v1304_v62, %v1005_v2  ;;  %1746 = vmatprep.subr.mxu1 %v1028_v0  ;;  %v1025_v5 = vmax.f32 %v1011_v1, 0.0 }
 0x3ce   : > { %1747 = vmatpush3.msra.mxu1 %v1028_v0 }
 0x3cf   : > { %v1024_v4 = vmax.f32 %v1006_v3, 0.0 }
 0x3d1   : > { %1748 = vmatprep.mubr.f32.mxu1 %v1024_v4 }
 0x3d2   : > { %1749 = vmatmul.mubr.f32.vlgmr.msra.gmra.mxu1 %v1025_v5 }
 0x46f   : > { %v903_v10 = vpop.f32.mrf.mxu1 }
 0x470   : > { %v904_v12 = vadd.f32 %v903_v10, %v592_v9 }
 0x471   : > { %v1677_v13 = vpop.f32.mrf.mxu1 }
 0x472   : > { %v907_v14 = vmax.f32 %v904_v12, 0.0 }
 0x474   : > { %909 = vst [vmem:[#allocation2] sm:$0xff] %v907_v14  ;;  %1714 = vmatmul.mubr.f32.gmra.mxu0 %v907_v14 }
 0x492   : > { %v1750_v16 = vpop.f32.mrf.mxu1 }
 0x493   : > { %v1124_v18 = vadd.f32 %v1750_v16, %v1306_v15 }
 0x494   : > { %v1118_v19 = vpop.f32.mrf.mxu1 }
 0x495   : > { %1138 = vst [vmem:[%s2305_s1 + $0x8] sm:$0xff] %v1124_v18  ;;  %v1119_v7 = vadd.f32 %v1306_v15, %v1118_v19 }
 0x497   : > { %1137 = vst [vmem:[%s2305_s1] sm:$0xff] %v1119_v7 }
 0x534   : > { %v1715_v11 = vpop.f32.mrf.mxu0 }
 0x535   : > { %v1021_v17 = vadd.f32 %v1715_v11, %v1304_v62 }
 0x536   : > { %v1015_v20 = vpop.f32.mrf.mxu0 }
 0x537   : > { %v1016_v21 = vadd.f32 %v1304_v62, %v1015_v20  ;;  %v1027_v23 = vmax.f32 %v1021_v17, 0.0 }
 0x539   : > { %v1026_v22 = vmax.f32 %v1016_v21, 0.0 }
 0x53b   : > { %1751 = vmatprep.mubr.f32.mxu1 %v1026_v22 }
 0x53c   : > { %1752 = vmatmul.mubr.f32.gmra.mxu1 %v1027_v23 }
 0x5fc   : > { %v1753_v24 = vpop.f32.mrf.mxu1 }
 0x5fd   : > { %v1134_v25 = vadd.f32 %v1753_v24, %v1306_v15 }
 0x5fe   : > { %v1128_v26 = vpop.f32.mrf.mxu1 }
 0x5ff   : > { %1140 = vst [vmem:[%s2305_s1 + $0x18] sm:$0xff] %v1134_v25  ;;  %v1129_v27 = vadd.f32 %v1306_v15, %v1128_v26 }
 0x601   : > { %1139 = vst [vmem:[%s2305_s1 + $0x10] sm:$0xff] %v1129_v27 }
 0x602   : > { %2009 = shalt.err (!%p2006_p10)
}
 0x603   : > { %s2010_s1 = scalar_lea.hbm %s2517_s29, 512  ;;  %s2014_s12 = scalar_lea.hbm %s2575_s6, 1024 }
 0x604   : > { %p2011_p12 = scmp.ne.s32.totalorder %s2517_s29, %s2010_s1  ;;  %p2015_p3 = scmp.lt.s32.totalorder %s2517_s29, %s2575_s6 }
 0x605   : > { %p2016_p9 = scmp.lt.s32.totalorder %s2014_s12, %s2010_s1 }
 0x606   : > { %p2012_p7 = pnand %p2011_p12, %p2257_p0 }
 0x607   : > { %p2017_p8 = por %p2016_p9, %p2015_p3 }
 0x608   : > { %p2013_p6 = pneg %p2012_p7 }
 0x60a   : > { %p2018_p1 = pnand %p2017_p8, %p2013_p6 }
 0x60c   : > { %2021 = shalt.err (!%p2018_p1)
}
 0x60d   : > { %s2097_s17 = smov 128   ;;  %s2098_s27 = smov 8  }
 0x60e   : > { %1772 = dma.vmem_to_hbm [thread:$0]  (%p2257_p0), %s2519_s2, 512, %s2517_s29, %s1142_s7, %s2097_s17, %s2097_s17, %s2098_s27  }
 0x60f PF: > { %s1171_s16 = sand.u32 1, %s2064_s21   ;;  %p2592_p4 = scmp.ne.s32.totalorder %s2583_s8, 0 }
 0x610   : > { %p2593_p13 = scmp.ge.s32.totalorder %s2084_s26, 2  ;;  %s1172_s9 = scalar_lea.sflag [#allocation6], %s1171_s16 }
 0x612   : > { %p1792_p11 = pnand %p2593_p13, %p2592_p4 }
 0x614   : > { %p1793_p2 = pneg %p1792_p11 }
 0x616   : > { %2059 = dma.done.wait (%p1793_p2), %s1172_s9, 512  }
 0x617   : > { %2061 = vsyncadd (%p1793_p2), %s1172_s9, 4294966784  ;;  %s24_s26 = sadd.s32 1, %s2084_s26   ;;  %s2594_s21 = smov %s2068_s22 }
 0x618   : > { %p21_p5 = scmp.ge.s32.totalorder %s24_s26, 4   ;;  %s2595_s22 = smov %s2072_s23 }
 0x619   : > { %s2596_s23 = smov %s2266_s20  ;;  %s2597_s24 = smov %s2080_s25 }
 0x61a   : > { %s2598_s25 = smov %s2600_s10  ;;  %23 = sbr.rel (!%p21_p5) target bundleno = 11 (0xb), region = 117 }
 0x61f   :  { %1177 = vsyncpa [#allocation5], 1 }
 0x620   :  { %1179 = vsyncpa [#allocation5 + $0x1], 1 }
 0x621   :  { %1180 = vsyncpa [#allocation8], 1 }
 0x622   :  { %1181 = vsyncpa [#allocation11], 1 }
 0x623   :  { %1182 = vsyncpa [#allocation6], 1 }
 0x624   :  { %1184 = vsyncpa [#allocation6 + $0x1], 1 }

// kernel: tpu_custom_call.1
= control target key start
LH: loop header
LB: loop body
LE: loop exit
PB: predicated region body
PF: predicated region fallthrough
CT: control target
= control target key end

     0   :  { %s2569_s0 = inlined_call_operand.hbm [shape: f32[8,8,128], index: 0, kind: input, shape index: {}]   ;;  %s2570_s1 = inlined_call_operand.hbm [shape: f32[128,128], index: 1, kind: input, shape index: {}]   ;;  %s2571_s2 = inlined_call_operand.hbm [shape: f32[2,128,128], index: 2, kind: input, shape index: {}]   ;;  %s2572_s3 = inlined_call_operand.hbm [shape: f32[128,128], index: 3, kind: input, shape index: {}]   ;;  %s2573_s4 = inlined_call_operand.hbm [shape: f32[128,128], index: 4, kind: input, shape index: {}]   ;;  %s2574_s5 = inlined_call_operand.vmem [shape: f32[5,1,128], index: 5, kind: input, shape index: {}]   ;;  %s2575_s6 = inlined_call_operand.hbm [shape: f32[8,8,128], index: 6, kind: output, shape index: {}]  }
   0x1   :  { %2578 = sst [smem:[#allocation18_spill]] %s2570_s1 }
   0x2   :  { %2579 = sst [smem:[#allocation19_spill]] %s2571_s2 }
   0x3   :  { %11 = vsyncpa [#allocation5], 0 }
   0x4   :  { %13 = vsyncpa [#allocation5 + $0x1], 0 }
   0x5   :  { %14 = vsyncpa [#allocation8], 0 }
   0x6   :  { %15 = vsyncpa [#allocation11], 0 }
   0x7   :  { %16 = vsyncpa [#allocation6], 0 }
   0x8   :  { %18 = vsyncpa [#allocation6 + $0x1], 0  ;;  %s2134_s21 = smov 0   ;;  %s2136_s22 = smov 0  }
   0x9   :  { %s2138_s23 = smov 0   ;;  %s2140_s24 = smov 0  }
   0xa   :  { %s2142_s25 = smov 0   ;;  %s2144_s26 = smov 0  }
   0xb LB: > { %s1279_s27 = sadd.s32 4294967295, %s2084_s26   ;;  %s1280_s28 = sadd.s32 4294967294, %s2084_s26   ;;  %s2084_s26 = sphi %s2144_s26, %s24_s26   ;;  %s2080_s25 = sphi %s2142_s25, %s2598_s25   ;;  %s2076_s24 = sphi %s2140_s24, %s2597_s24   ;;  %s2072_s23 = sphi %s2138_s23, %s2596_s23   ;;  %s2068_s22 = sphi %s2136_s22, %s2595_s22   ;;  %s2064_s21 = sphi %s2134_s21, %s2594_s21  }
   0xc   : > { %p58_p0 = scmp.ne.s32.totalorder %s2068_s22, %s2064_s21  ;;  %p2168_p1 = scmp.eq.s32.totalorder %s1279_s27, 0 }
   0xd   : > { %p2172_p2 = scmp.eq.s32.totalorder %s1279_s27, 1  ;;  %p195_p3 = scmp.eq.s32.totalorder %s1280_s28, 1 }
   0xe   : > { %p2178_p4 = por %p2168_p1, %p58_p0  ;;  %p1281_p5 = scmp.ge.s32.totalorder %s2084_s26, 1 }
   0xf   : > { %p2183_p6 = por %p195_p3, %p58_p0  ;;  %p202_p7 = scmp.lt.s32.totalorder %s2084_s26, 3 }
  0x10   : > { %s2086_s10 = smov [#allocation7]   ;;  %s2087_s13 = smov [#allocation10]  }
  0x11   : > { %s2583_s8 = scalar_select %p2183_p6, 1, 0 }
  0x12   : > { %p2188_p8 = pnand %p1281_p5, %p202_p7  ;;  %s214_s11 = sshll.u32 %s2086_s10, 4  ;;  %s215_s11 = int_to_ptr.vmem [resolvable:$true] %s214_s11 }
  0x13   : > { %s240_s14 = sshll.u32 %s2087_s13, 4  ;;  %s2088_s15 = smov [#allocation9]   ;;  %s241_s14 = int_to_ptr.vmem [resolvable:$true] %s240_s14 }
  0x14   : > { %p1774_p9 = pneg %p2188_p8  ;;  %s227_s16 = sshll.u32 %s2088_s15, 4  ;;  %s228_s16 = int_to_ptr.vmem [resolvable:$true] %s227_s16 }
  0x15   : > { %s1875_s17 = scalar_lea.vmem %s215_s11, 2048  ;;  %p1883_p5 = scmp.lt.s32.totalorder %s215_s11, %s215_s11 }
  0x16   : > { %p2197_p11 = pnand %p1774_p9, %p2168_p1  ;;  %p1876_p13 = scmp.ne.s32.totalorder %s215_s11, %s1875_s17 }
  0x17   : > { %p1884_p7 = scmp.lt.s32.totalorder %s1875_s17, %s1875_s17 }
  0x18   : > { %p1866_p12 = pneg %p2197_p11 }
  0x19   : > { %p1885_p9 = por %p1884_p7, %p1883_p5 }
  0x1a   : > { %p1878_p0 = pnand %p1876_p13, %p1866_p12 }
  0x1c   : > { %p1879_p3 = pneg %p1878_p0 }
  0x1e   : > { %p1886_p10 = pnand %p1885_p9, %p1879_p3 }
  0x20   : > { %1889 = shalt.err (!%p1886_p10)
}
  0x21   : > { %s2576_s18 = smov 128   ;;  %s2577_s19 = smov 8  }
  0x22   : > { %s2586_s1 = sld [smem:[#allocation18_spill]]  ;;  %s1901_s28 = scalar_lea.vmem %s241_s14, 2048 }
  0x23   : > { %p1902_p13 = scmp.ne.s32.totalorder %s241_s14, %s1901_s28  ;;  %p1909_p3 = scmp.lt.s32.totalorder %s241_s14, %s241_s14 }
  0x24   : > { %p1910_p10 = scmp.lt.s32.totalorder %s1901_s28, %s1901_s28 }
  0x25   : > { %p1904_p0 = pnand %p1902_p13, %p1866_p12 }
  0x26   : > { %p1911_p7 = por %p1910_p10, %p1909_p3 }
  0x27   : > { %p1905_p5 = pneg %p1904_p0 }
  0x28   : > { %1777 = dma.hbm_to_vmem [thread:$0]  (!%p2197_p11), %s2586_s1, 2048, %s215_s11, [#allocation8], %s2576_s18, %s2576_s18, %s2577_s19  }
  0x29   : > { %p1912_p9 = pnand %p1911_p7, %p1905_p5 }
  0x2b   : > { %1915 = shalt.err (!%p1912_p9)
}
  0x2c   : > { %1783 = dma.hbm_to_vmem [thread:$0]  (!%p2197_p11), %s2572_s3, 2048, %s241_s14, [#allocation11], %s2576_s18, %s2576_s18, %s2577_s19  }
  0x2d   : > { %s1927_s11 = scalar_lea.vmem %s228_s16, 4096  ;;  %p1935_p3 = scmp.lt.s32.totalorder %s228_s16, %s228_s16 }
  0x2e   : > { %p1928_p6 = scmp.ne.s32.totalorder %s228_s16, %s1927_s11  ;;  %p1936_p5 = scmp.lt.s32.totalorder %s1927_s11, %s1927_s11 }
  0x30   : > { %p1930_p13 = pnand %p1928_p6, %p1866_p12  ;;  %p1937_p10 = por %p1936_p5, %p1935_p3 }
  0x32   : > { %p1931_p0 = pneg %p1930_p13 }
  0x34   : > { %p1938_p7 = pnand %p1937_p10, %p1931_p0 }
  0x36   : > { %1941 = shalt.err (!%p1938_p7)
}
  0x37   : > { %s2587_s2 = sld [smem:[#allocation19_spill]]  ;;  %s2091_s14 = smov [#allocation12]  }
  0x38   : > { %s253_s20 = sshll.u32 %s2091_s14, 4  ;;  %s254_s20 = int_to_ptr.vmem [resolvable:$true] %s253_s20 }
  0x39   : > { %s1953_s27 = scalar_lea.vmem %s254_s20, 2048  ;;  %p1961_p0 = scmp.lt.s32.totalorder %s254_s20, %s254_s20 }
  0x3a   : > { %p1954_p6 = scmp.ne.s32.totalorder %s254_s20, %s1953_s27  ;;  %p1962_p3 = scmp.lt.s32.totalorder %s1953_s27, %s1953_s27 }
  0x3c   : > { %p1956_p9 = pnand %p1954_p6, %p1866_p12  ;;  %p1963_p5 = por %p1962_p3, %p1961_p0 }
  0x3d   : > { %1780 = dma.hbm_to_vmem [thread:$0]  (!%p2197_p11), %s2587_s2, 4096, %s228_s16, [#allocation8], %s2576_s18, %s2576_s18, %s2577_s19  }
  0x3e   : > { %p1957_p13 = pneg %p1956_p9 }
  0x40   : > { %p1964_p10 = pnand %p1963_p5, %p1957_p13 }
  0x42   : > { %1967 = shalt.err (!%p1964_p10)
}
  0x43   : > { %1786 = dma.hbm_to_vmem [thread:$0]  (!%p2197_p11), %s2573_s4, 2048, %s254_s20, [#allocation11], %s2576_s18, %s2576_s18, %s2577_s19  }
  0x44   : > { %s33_s10 = sadd.s32 1, %s2080_s25  ;;  %s45_s12 = sadd.s32 1, %s2072_s23 }
  0x45   : > { %p34_p12 = scmp.ge.s32.totalorder %s33_s10, 2  ;;  %p52_p7 = scmp.ne.s32.totalorder %s2072_s23, %s2068_s22 }
  0x46   : > { %p53_p6 = scmp.eq.s32.totalorder %s2084_s26, 0  ;;  %p1799_p9 = scmp.lt.s32.totalorder %s2084_s26, 2 }
  0x47   : > { %s2600_s10 = smov (%p34_p12, %s33_s10), 0  ;;  %p2257_p0 = por %p2172_p2, %p52_p7 }
  0x48   : > { %p54_p13 = por %p53_p6, %p52_p7  ;;  %s40_s11 = ssub.s32 %s2080_s25, %s2600_s10 }
  0x49   : > { %s270_s15 = sand.u32 1, %s2072_s23   ;;  %p43_p3 = scmp.eq.s32.totalorder %s40_s11, 0 }
  0x4a   : > { %s1287_s17 = sshll.u32 %s270_s15, 5  ;;  %s1312_s14 = sshll.u32 %s2080_s25, 9 }
  0x4b   : > { %s2266_s20 = scalar_select %p43_p3, %s2072_s23, %s45_s12  }
  0x4c   : > { %s281_s28 = scalar_lea.hbm %s2569_s0, %s1312_s14  ;;  %s274_s18 = scalar_lea.vmem [#allocation4], %s1287_s17 }
  0x4d   : > { %s282_s19 = sshll.u32 %s274_s18, 4  ;;  %p2273_p11 = pnand %p1799_p9, %p54_p13  ;;  %s283_s19 = int_to_ptr.vmem [resolvable:$true] %s282_s19 }
  0x4e   : > { %s271_s1 = scalar_lea.sflag [#allocation5], %s270_s15  ;;  %s1981_s11 = scalar_lea.vmem %s283_s19, 512 }
  0x4f   : > { %p1970_p2 = pneg %p2273_p11  ;;  %p1982_p5 = scmp.ne.s32.totalorder %s283_s19, %s1981_s11 }
  0x50   : > { %s2092_s12 = smov [#allocation4]  }
  0x51   : > { %p1984_p10 = pnand %p1982_p5, %p1970_p2  ;;  %s1986_s2 = sshll.u32 %s2092_s12, 4  ;;  %s1987_s2 = int_to_ptr.vmem [resolvable:$false] %s1986_s2 }
  0x52   : > { %s1988_s14 = scalar_lea.vmem %s1987_s2, 1024  ;;  %p1989_p7 = scmp.lt.s32.totalorder %s283_s19, %s1987_s2 }
  0x53   : > { %p1985_p12 = pneg %p1984_p10  ;;  %p1990_p6 = scmp.lt.s32.totalorder %s1988_s14, %s1981_s11 }
  0x55   : > { %p1991_p3 = por %p1990_p6, %p1989_p7 }
  0x57   : > { %p1992_p9 = pnand %p1991_p3, %p1985_p12 }
  0x59   : > { %1995 = shalt.err (!%p1992_p9)
}
  0x5a   : > { %s2590_s18 = smov 8   ;;  %s2591_s17 = smov 128  }
  0x5b   : > { %1790 = dma.hbm_to_vmem [thread:$0]  (!%p2273_p11), %s281_s28, 512, %s283_s19, %s271_s1, %s2591_s17, %s2591_s17, %s2590_s18  }
  0x5c   : > { %294 = sbr.rel (%p2188_p8) target bundleno = 1551 (0x60f), region = 44  ;;  %s2287_s15 = sand.u32 (!%p2188_p8), 1, %s2068_s22  }
  0x5d   : > { %s1291_s2 = sshll.u32 (!%p2188_p8), %s2287_s15, 5  ;;  %s297_s27 = scalar_lea.sflag (!%p2188_p8), [#allocation5], %s2287_s15 }
  0x5e   : > { %s2291_s16 = scalar_lea.vmem (!%p2188_p8), [#allocation4], %s1291_s2 }
  0x61   : > { %2047 = dma.done.wait (%p2178_p4), %s297_s27, 512  }
  0x62   : > { %2049 = vsyncadd (%p2178_p4), %s297_s27, 4294966784 }
  0x63   : > { %2051 = dma.done.wait (%p2168_p1), [#allocation8], 6144  }
  0x64   : > { %2053 = vsyncadd (%p2168_p1), [#allocation8], 4294961152 }
  0x65   : > { %2055 = dma.done.wait (%p2168_p1), [#allocation11], 4096  }
  0x66   : > { %2057 = vsyncadd (%p2168_p1), [#allocation11], 4294963200  ;;  %s2305_s1 = scalar_lea.vmem [#allocation13], %s1291_s2  ;;  %p1297_p8 = scmp.ne.s32.totalorder %s2076_s24, 0 }
  0x68   : > { %350 = sbr.rel (%p1297_p8) target bundleno = 111 (0x6f), region = 68 }
  0x6d   : > { %v2093_v0 = vmov 0.0  }
  0x6e   : > { %351 = vst [vmem:[#allocation2] sm:$0xff] %v2093_v0 }
  0x6f PF: > { %v371_v1 = vld [vmem:[#allocation7 + $0x78] sm:$0xff]  ;;  %v370_v2 = vld [vmem:[#allocation7 + $0x70] sm:$0xff]  ;;  %v369_v3 = vld [vmem:[#allocation7 + $0x68] sm:$0xff]  ;;  %v2094_v32 = vmov 0.0   ;;  %vm2095_vm0 = vmmov 0   ;;  %s1313_s17 = sshll.u32 %s2076_s24, 9 }
  0x70   : > { %1462 = vmatprep.subr.mxu0 %v371_v1  ;;  %v368_v4 = vld [vmem:[#allocation7 + $0x60] sm:$0xff]  ;;  %v367_v6 = vld [vmem:[#allocation7 + $0x58] sm:$0xff]  ;;  %v482_v8 = vld [vmem:[#allocation9 + $0x70] sm:$0xff]  ;;  %s1156_s2 = sshll.u32 %s2305_s1, 4  ;;  %s2517_s29 = scalar_lea.hbm %s2575_s6, %s1313_s17  ;;  %s2519_s2 = int_to_ptr.vmem [resolvable:$true] %s1156_s2 }
  0x71   : > { %1463 = vmatpush3.msra.mxu0 %v371_v1  ;;  %v352_v5 = vld [vmem:[%s2291_s16] sm:$0xff]  ;;  %v483_v7 = vld [vmem:[#allocation9 + $0x78] sm:$0xff]  ;;  %v366_v9 = vld [vmem:[#allocation7 + $0x50] sm:$0xff]  ;;  %s1142_s7 = scalar_lea.sflag [#allocation6], %s2287_s15  ;;  %s1996_s9 = scalar_lea.vmem %s2519_s2, 512 }
  0x72   : > { %1464 = vmatprep.subr.mxu0 %v370_v2  ;;  %1494 = vmatprep.mubr.f32.mxu0 %v352_v5  ;;  %v481_v10 = vld [vmem:[#allocation9 + $0x68] sm:$0xff]  ;;  %v480_v12 = vld [vmem:[#allocation9 + $0x60] sm:$0xff]  ;;  %v479_v14 = vld [vmem:[#allocation9 + $0x58] sm:$0xff]  ;;  %p1997_p1 = scmp.ne.s32.totalorder %s2519_s2, %s1996_s9  ;;  %s2096_s24 = smov [#allocation13]  }
  0x73   : > { %1465 = vmatpush3.msra.mxu0 %v370_v2  ;;  %1500 = vmatprep.subr.mxu1 %v483_v7  ;;  %v365_v11 = vld [vmem:[#allocation7 + $0x48] sm:$0xff]  ;;  %v364_v13 = vld [vmem:[#allocation7 + $0x40] sm:$0xff]  ;;  %v363_v15 = vld [vmem:[#allocation7 + $0x38] sm:$0xff]  ;;  %s2000_s19 = sshll.u32 %s2096_s24, 4  ;;  %s2001_s19 = int_to_ptr.vmem [resolvable:$false] %s2000_s19 }
  0x74   : > { %1466 = vmatprep.subr.mxu0 %v369_v3  ;;  %1501 = vmatpush3.msra.mxu1 %v483_v7  ;;  %v478_v16 = vld [vmem:[#allocation9 + $0x50] sm:$0xff]  ;;  %v477_v18 = vld [vmem:[#allocation9 + $0x48] sm:$0xff]  ;;  %v476_v20 = vld [vmem:[#allocation9 + $0x40] sm:$0xff]  ;;  %p1998_p4 = pnand %p1997_p1, %p2257_p0  ;;  %s2002_s28 = scalar_lea.vmem %s2001_s19, 1024 }
  0x75   : > { %1467 = vmatpush3.msra.mxu0 %v369_v3  ;;  %1502 = vmatprep.subr.mxu1 %v482_v8  ;;  %v362_v17 = vld [vmem:[#allocation7 + $0x30] sm:$0xff]  ;;  %v361_v19 = vld [vmem:[#allocation7 + $0x28] sm:$0xff]  ;;  %v360_v21 = vld [vmem:[#allocation7 + $0x20] sm:$0xff]  ;;  %p2003_p11 = scmp.lt.s32.totalorder %s2519_s2, %s2001_s19  ;;  %p2004_p2 = scmp.lt.s32.totalorder %s2002_s28, %s1996_s9 }
  0x76   : > { %1468 = vmatprep.subr.mxu0 %v368_v4  ;;  %1503 = vmatpush3.msra.mxu1 %v482_v8  ;;  %v475_v22 = vld [vmem:[#allocation9 + $0x38] sm:$0xff]  ;;  %v474_v24 = vld [vmem:[#allocation9 + $0x30] sm:$0xff]  ;;  %v473_v26 = vld [vmem:[#allocation9 + $0x28] sm:$0xff]  ;;  %p1999_p13 = pneg %p1998_p4 }
  0x77   : > { %1469 = vmatpush3.msra.mxu0 %v368_v4  ;;  %1504 = vmatprep.subr.mxu1 %v481_v10  ;;  %v359_v23 = vld [vmem:[#allocation7 + $0x18] sm:$0xff]  ;;  %v358_v25 = vld [vmem:[#allocation7 + $0x10] sm:$0xff]  ;;  %v357_v27 = vld [vmem:[#allocation7 + $0x8] sm:$0xff]  ;;  %p2005_p5 = por %p2004_p2, %p2003_p11 }
  0x78   : > { %1470 = vmatprep.subr.mxu0 %v367_v6  ;;  %1505 = vmatpush3.msra.mxu1 %v481_v10  ;;  %v472_v28 = vld [vmem:[#allocation9 + $0x20] sm:$0xff]  ;;  %v353_v30 = vld [vmem:[%s2291_s16 + $0x8] sm:$0xff]  ;;  %v2310_v31 = vld [vmem:[#allocation10 + $0x78] sm:$0xff] }
  0x79   : > { %1471 = vmatpush3.msra.mxu0 %v367_v6  ;;  %1506 = vmatprep.subr.mxu1 %v480_v12  ;;  %v356_v29 = vld [vmem:[#allocation7] sm:$0xff]  ;;  %v2313_v33 = vld [vmem:[#allocation10 + $0x70] sm:$0xff]  ;;  %v2317_v34 = vld [vmem:[#allocation10 + $0x68] sm:$0xff]  ;;  %p2006_p10 = pnand %p2005_p5, %p1999_p13 }
  0x7a   : > { %1472 = vmatprep.subr.mxu0 %v366_v9  ;;  %1507 = vmatpush3.msra.mxu1 %v480_v12  ;;  %v2321_v35 = vld [vmem:[#allocation10 + $0x60] sm:$0xff]  ;;  %v2325_v36 = vld [vmem:[#allocation10 + $0x58] sm:$0xff]  ;;  %v2329_v37 = vld [vmem:[#allocation10 + $0x50] sm:$0xff] }
  0x7b   : > { %1473 = vmatpush3.msra.mxu0 %v366_v9  ;;  %1508 = vmatprep.subr.mxu1 %v479_v14  ;;  %v2333_v38 = vld [vmem:[#allocation10 + $0x48] sm:$0xff]  ;;  %v2337_v39 = vld [vmem:[#allocation10 + $0x40] sm:$0xff]  ;;  %v2341_v40 = vld [vmem:[#allocation10 + $0x38] sm:$0xff] }
  0x7c   : > { %1474 = vmatprep.subr.mxu0 %v365_v11  ;;  %1509 = vmatpush3.msra.mxu1 %v479_v14  ;;  %v471_v41 = vld [vmem:[#allocation9 + $0x18] sm:$0xff]  ;;  %v2347_v42 = vld [vmem:[#allocation10 + $0x30] sm:$0xff]  ;;  %v2352_v45 = vld [vmem:[#allocation10 + $0x28] sm:$0xff] }
  0x7d   : > { %1475 = vmatpush3.msra.mxu0 %v365_v11  ;;  %1510 = vmatprep.subr.mxu1 %v478_v16  ;;  %v470_v43 = vld [vmem:[#allocation9 + $0x10] sm:$0xff]  ;;  %v355_v46 = vld [vmem:[%s2291_s16 + $0x18] sm:$0xff]  ;;  %v469_v47 = vld [vmem:[#allocation9 + $0x8] sm:$0xff] }
  0x7e   : > { %1476 = vmatprep.subr.mxu0 %v364_v13  ;;  %1511 = vmatpush3.msra.mxu1 %v478_v16  ;;  %v354_v44 = vld [vmem:[%s2291_s16 + $0x10] sm:$0xff]  ;;  %v2355_v48 = vld [vmem:[#allocation10 + $0x20] sm:$0xff]  ;;  %v2360_v50 = vld [vmem:[#allocation10 + $0x18] sm:$0xff] }
  0x7f   : > { %1477 = vmatpush3.msra.mxu0 %v364_v13  ;;  %1512 = vmatprep.subr.mxu1 %v477_v18  ;;  %v468_v49 = vld [vmem:[#allocation9] sm:$0xff]  ;;  %v2364_v51 = vld [vmem:[#allocation10 + $0x10] sm:$0xff]  ;;  %v2367_v52 = vld [vmem:[#allocation10 + $0x8] sm:$0xff] }
  0x80   : > { %1478 = vmatprep.subr.mxu0 %v363_v15  ;;  %1513 = vmatpush3.msra.mxu1 %v477_v18  ;;  %v2374_v53 = vld [vmem:[#allocation10] sm:$0xff]  ;;  %v613_v54 = vld [vmem:[#allocation2] sm:$0xff] }
  0x81   : > { %1479 = vmatpush3.msra.mxu0 %v363_v15  ;;  %1514 = vmatprep.subr.mxu1 %v476_v20  ;;  %v1298_v55 = vld [vmem:[%s2574_s5] ss:$0 sm:$0xff]  ;;  %v2453_v7 = vld [vmem:[%s2574_s5 + $0x1] ss:$0 sm:$0xff]  ;;  %v2459_v11 = vld [vmem:[%s2574_s5 + $0x2] ss:$0 sm:$0xff] }
  0x82   : > { %1480 = vmatprep.subr.mxu0 %v362_v17  ;;  %1515 = vmatpush3.msra.mxu1 %v476_v20  ;;  %v930_v15 = vld [vmem:[#allocation9 + $0xf8] sm:$0xff] }
  0x83   : > { %1481 = vmatpush3.msra.mxu0 %v362_v17  ;;  %1516 = vmatprep.subr.mxu1 %v475_v22 }
  0x84   : > { %1482 = vmatprep.subr.mxu0 %v361_v19  ;;  %1517 = vmatpush3.msra.mxu1 %v475_v22 }
  0x85   : > { %1483 = vmatpush3.msra.mxu0 %v361_v19  ;;  %1518 = vmatprep.subr.mxu1 %v474_v24 }
  0x86   : > { %1484 = vmatprep.subr.mxu0 %v360_v21  ;;  %1519 = vmatpush3.msra.mxu1 %v474_v24 }
  0x87   : > { %1485 = vmatpush3.msra.mxu0 %v360_v21  ;;  %1520 = vmatprep.subr.mxu1 %v473_v26 }
  0x88   : > { %1486 = vmatprep.subr.mxu0 %v359_v23  ;;  %1521 = vmatpush3.msra.mxu1 %v473_v26  ;;  %v928_v26 = vld [vmem:[#allocation9 + $0xe8] sm:$0xff] }
  0x89   : > { %1487 = vmatpush3.msra.mxu0 %v359_v23  ;;  %1522 = vmatprep.subr.mxu1 %v472_v28 }
  0x8a   : > { %1488 = vmatprep.subr.mxu0 %v358_v25  ;;  %1523 = vmatpush3.msra.mxu1 %v472_v28  ;;  %v926_v28 = vld [vmem:[#allocation9 + $0xd8] sm:$0xff] }
  0x8b   : > { %1489 = vmatpush3.msra.mxu0 %v358_v25  ;;  %1524 = vmatprep.subr.mxu1 %v471_v41  ;;  %v929_v25 = vld [vmem:[#allocation9 + $0xf0] sm:$0xff] }
  0x8c   : > { %1490 = vmatprep.subr.mxu0 %v357_v27  ;;  %1525 = vmatpush3.msra.mxu1 %v471_v41 }
  0x8d   : > { %1491 = vmatpush3.msra.mxu0 %v357_v27  ;;  %1526 = vmatprep.subr.mxu1 %v470_v43  ;;  %v927_v27 = vld [vmem:[#allocation9 + $0xe0] sm:$0xff] }
  0x8e   : > { %1492 = vmatprep.subr.mxu0 %v356_v29  ;;  %1527 = vmatpush3.msra.mxu1 %v470_v43 }
  0x8f   : > { %1493 = vmatpush3.msra.mxu0 %v356_v29  ;;  %1528 = vmatprep.subr.mxu1 %v469_v47  ;;  %v925_v29 = vld [vmem:[#allocation9 + $0xd0] sm:$0xff] }
  0x90   : > { %1495 = vmatmul.mubr.f32.vlgmr.msra.gmra.mxu0 %v353_v30  ;;  %1538 = vmatprep.subr.mxu0 %v2094_v32  ;;  %v924_v30 = vld [vmem:[#allocation9 + $0xc8] sm:$0xff] }
  0x91   : > { %1539 = vmatpush3.msra.mxu0 %v2310_v31  ;;  %1497 = vmatprep.mubr.f32.mxu0 %v354_v44 }
  0x92   : > { %1540 = vmatprep.subr.mxu0 %v2094_v32  ;;  %1529 = vmatpush3.msra.mxu1 %v469_v47 }
  0x93   : > { %1541 = vmatpush3.msra.mxu0 %v2313_v33  ;;  %1530 = vmatprep.subr.mxu1 %v468_v49 }
  0x94   : > { %1542 = vmatprep.subr.mxu0 %v2094_v32  ;;  %1498 = vmatmul.mubr.f32.gmra.mxu0 %v355_v46 }
  0x95   : > { %1543 = vmatpush3.msra.mxu0 %v2317_v34  ;;  %1531 = vmatpush3.msra.mxu1 %v468_v49  ;;  %v1041_v49 = vld [vmem:[#allocation12 + $0x68] sm:$0xff] }
  0x96   : > { %1544 = vmatprep.subr.mxu0 %v2094_v32  ;;  %1570 = vmatprep.mubr.msk.f32.mxu0 %vm2095_vm0, %v2094_v32 }
  0x97   : > { %1545 = vmatpush3.msra.mxu0 %v2321_v35  ;;  %1573 = vmatprep.subr.mxu1 %v2094_v32 }
  0x98   : > { %1546 = vmatprep.subr.mxu0 %v2094_v32 }
  0x99   : > { %1547 = vmatpush3.msra.mxu0 %v2325_v36 }
  0x9a   : > { %1548 = vmatprep.subr.mxu0 %v2094_v32 }
  0x9b   : > { %1549 = vmatpush3.msra.mxu0 %v2329_v37 }
  0x9c   : > { %1550 = vmatprep.subr.mxu0 %v2094_v32 }
  0x9d   : > { %1551 = vmatpush3.msra.mxu0 %v2333_v38 }
  0x9e   : > { %1552 = vmatprep.subr.mxu0 %v2094_v32 }
  0x9f   : > { %1553 = vmatpush3.msra.mxu0 %v2337_v39 }
  0xa0   : > { %1554 = vmatprep.subr.mxu0 %v2094_v32 }
  0xa1   : > { %1555 = vmatpush3.msra.mxu0 %v2341_v40 }
  0xa2   : > { %1556 = vmatprep.subr.mxu0 %v2094_v32 }
  0xa3   : > { %1557 = vmatpush3.msra.mxu0 %v2347_v42 }
  0xa4   : > { %1558 = vmatprep.subr.mxu0 %v2094_v32 }
  0xa5   : > { %1559 = vmatpush3.msra.mxu0 %v2352_v45 }
  0xa6   : > { %1560 = vmatprep.subr.mxu0 %v2094_v32 }
  0xa7   : > { %1561 = vmatpush3.msra.mxu0 %v2355_v48 }
  0xa8   : > { %1562 = vmatprep.subr.mxu0 %v2094_v32 }
  0xa9   : > { %1563 = vmatpush3.msra.mxu0 %v2360_v50 }
  0xaa   : > { %1564 = vmatprep.subr.mxu0 %v2094_v32 }
  0xab   : > { %1565 = vmatpush3.msra.mxu0 %v2364_v51 }
  0xac   : > { %1566 = vmatprep.subr.mxu0 %v2094_v32 }
  0xad   : > { %1567 = vmatpush3.msra.mxu0 %v2367_v52 }
  0xae   : > { %1568 = vmatprep.subr.mxu0 %v2094_v32 }
  0xaf   : > { %1569 = vmatpush3.msra.mxu0 %v2374_v53 }
  0xb0   : > { %1571 = vmatmul.mubr.f32.vlgmr.msra.gmra.mxu0 %v613_v54  ;;  %1608 = vmatprep.subr.mxu0 %v2094_v32  ;;  %v1036_v54 = vld [vmem:[#allocation12 + $0x40] sm:$0xff] }
  0xb1   : > { %1609 = vmatpush3.msra.mxu0 %v2310_v31  ;;  %1640 = vmatprep.mubr.msk.f32.mxu0 %vm2095_vm0, %v2094_v32 }
  0xb2   : > { %1610 = vmatprep.subr.mxu0 %v2094_v32 }
  0xb3   : > { %1611 = vmatpush3.msra.mxu0 %v2313_v33 }
  0xb4   : > { %1612 = vmatprep.subr.mxu0 %v2094_v32 }
  0xb5   : > { %1613 = vmatpush3.msra.mxu0 %v2317_v34 }
  0xb6   : > { %1614 = vmatprep.subr.mxu0 %v2094_v32 }
  0xb7   : > { %1615 = vmatpush3.msra.mxu0 %v2321_v35 }
  0xb8   : > { %1616 = vmatprep.subr.mxu0 %v2094_v32 }
  0xb9   : > { %1617 = vmatpush3.msra.mxu0 %v2325_v36 }
  0xba   : > { %1618 = vmatprep.subr.mxu0 %v2094_v32 }
  0xbb   : > { %1619 = vmatpush3.msra.mxu0 %v2329_v37 }
  0xbc   : > { %1620 = vmatprep.subr.mxu0 %v2094_v32 }
  0xbd   : > { %1621 = vmatpush3.msra.mxu0 %v2333_v38 }
  0xbe   : > { %1622 = vmatprep.subr.mxu0 %v2094_v32 }
  0xbf   : > { %1623 = vmatpush3.msra.mxu0 %v2337_v39 }
  0xc0   : > { %1624 = vmatprep.subr.mxu0 %v2094_v32 }
  0xc1   : > { %1625 = vmatpush3.msra.mxu0 %v2341_v40 }
  0xc2   : > { %1626 = vmatprep.subr.mxu0 %v2094_v32 }
  0xc3   : > { %1627 = vmatpush3.msra.mxu0 %v2347_v42 }
  0xc4   : > { %1628 = vmatprep.subr.mxu0 %v2094_v32 }
  0xc5   : > { %1629 = vmatpush3.msra.mxu0 %v2352_v45 }
  0xc6   : > { %1630 = vmatprep.subr.mxu0 %v2094_v32 }
  0xc7   : > { %1631 = vmatpush3.msra.mxu0 %v2355_v48 }
  0xc8   : > { %1632 = vmatprep.subr.mxu0 %v2094_v32 }
  0xc9   : > { %1633 = vmatpush3.msra.mxu0 %v2360_v50 }
  0xca   : > { %1634 = vmatprep.subr.mxu0 %v2094_v32 }
  0xcb   : > { %1635 = vmatpush3.msra.mxu0 %v2364_v51 }
  0xcc   : > { %1636 = vmatprep.subr.mxu0 %v2094_v32 }
  0xcd   : > { %1637 = vmatpush3.msra.mxu0 %v2367_v52 }
  0xce   : > { %1638 = vmatprep.subr.mxu0 %v2094_v32 }
  0xcf   : > { %1639 = vmatpush3.msra.mxu0 %v2374_v53 }
  0xd0   : > { %1678 = vmatprep.subr.mxu0 %v930_v15 }
 0x150   : > { %v1496_v56 = vpop.f32.mrf.mxu0 }
 0x151   : > { %v451_v57 = vadd.f32 %v1496_v56, %v1298_v55  ;;  %v1034_v56 = vld [vmem:[#allocation12 + $0x30] sm:$0xff] }
 0x152   : > { %v445_v58 = vpop.f32.mrf.mxu0 }
 0x153   : > { %v446_v59 = vadd.f32 %v1298_v55, %v445_v58  ;;  %v465_v61 = vmax.f32 %v451_v57, 0.0  ;;  %v1033_v57 = vld [vmem:[#allocation12 + $0x28] sm:$0xff]  ;;  %v1032_v58 = vld [vmem:[#allocation12 + $0x20] sm:$0xff] }
 0x154   : > { %v1499_v62 = vpop.f32.mrf.mxu0 }
 0x155   : > { %v464_v60 = vmax.f32 %v446_v59, 0.0  ;;  %v461_v63 = vadd.f32 %v1499_v62, %v1298_v55  ;;  %v1031_v59 = vld [vmem:[#allocation12 + $0x18] sm:$0xff] }
 0x156   : > { %v455_v0 = vpop.f32.mrf.mxu0  ;;  %v1304_v62 = vld [vmem:[%s2574_s5 + $0x3] ss:$0 sm:$0xff] }
 0x157   : > { %1532 = vmatprep.mubr.f32.mxu1 %v464_v60  ;;  %v456_v1 = vadd.f32 %v1298_v55, %v455_v0  ;;  %v467_v2 = vmax.f32 %v461_v63, 0.0  ;;  %v1035_v55 = vld [vmem:[#allocation12 + $0x38] sm:$0xff]  ;;  %v1030_v60 = vld [vmem:[#allocation12 + $0x10] sm:$0xff]  ;;  %v1028_v0 = vld [vmem:[#allocation12] sm:$0xff] }
 0x158   : > { %1533 = vmatmul.mubr.f32.vlgmr.msra.gmra.mxu1 %v465_v61  ;;  %v1029_v61 = vld [vmem:[#allocation12 + $0x8] sm:$0xff] }
 0x159   : > { %1574 = vmatpush3.msra.mxu1 %v2310_v31  ;;  %v466_v3 = vmax.f32 %v456_v1, 0.0 }
 0x15a   : > { %1575 = vmatprep.subr.mxu1 %v2094_v32 }
 0x15b   : > { %1576 = vmatpush3.msra.mxu1 %v2313_v33  ;;  %1535 = vmatprep.mubr.f32.mxu1 %v466_v3 }
 0x15c   : > { %1577 = vmatprep.subr.mxu1 %v2094_v32  ;;  %1536 = vmatmul.mubr.f32.gmra.mxu1 %v467_v2 }
 0x15d   : > { %1578 = vmatpush3.msra.mxu1 %v2317_v34  ;;  %1605 = vmatprep.mubr.msk.f32.mxu1 %vm2095_vm0, %v2094_v32 }
 0x15e   : > { %1579 = vmatprep.subr.mxu1 %v2094_v32 }
 0x15f   : > { %1580 = vmatpush3.msra.mxu1 %v2321_v35 }
 0x160   : > { %1581 = vmatprep.subr.mxu1 %v2094_v32 }
 0x161   : > { %1582 = vmatpush3.msra.mxu1 %v2325_v36 }
 0x162   : > { %1583 = vmatprep.subr.mxu1 %v2094_v32 }
 0x163   : > { %1584 = vmatpush3.msra.mxu1 %v2329_v37 }
 0x164   : > { %1585 = vmatprep.subr.mxu1 %v2094_v32 }
 0x165   : > { %1586 = vmatpush3.msra.mxu1 %v2333_v38 }
 0x166   : > { %1587 = vmatprep.subr.mxu1 %v2094_v32 }
 0x167   : > { %1588 = vmatpush3.msra.mxu1 %v2337_v39 }
 0x168   : > { %1589 = vmatprep.subr.mxu1 %v2094_v32 }
 0x169   : > { %1590 = vmatpush3.msra.mxu1 %v2341_v40 }
 0x16a   : > { %1591 = vmatprep.subr.mxu1 %v2094_v32 }
 0x16b   : > { %1592 = vmatpush3.msra.mxu1 %v2347_v42 }
 0x16c   : > { %1593 = vmatprep.subr.mxu1 %v2094_v32 }
 0x16d   : > { %1594 = vmatpush3.msra.mxu1 %v2352_v45 }
 0x16e   : > { %1595 = vmatprep.subr.mxu1 %v2094_v32 }
 0x16f   : > { %1596 = vmatpush3.msra.mxu1 %v2355_v48 }
 0x170   : > { %1597 = vmatprep.subr.mxu1 %v2094_v32  ;;  %v681_v4 = vpop.f32.mrf.mxu0 }
 0x171   : > { %1598 = vmatpush3.msra.mxu1 %v2360_v50 }
 0x172   : > { %1599 = vmatprep.subr.mxu1 %v2094_v32  ;;  %v1572_v5 = vpop.f32.mrf.mxu0 }
 0x173   : > { %1600 = vmatpush3.msra.mxu1 %v2364_v51 }
 0x174   : > { %1601 = vmatprep.subr.mxu1 %v2094_v32 }
 0x175   : > { %1602 = vmatpush3.msra.mxu1 %v2367_v52 }
 0x176   : > { %1603 = vmatprep.subr.mxu1 %v2094_v32 }
 0x177   : > { %1604 = vmatpush3.msra.mxu1 %v2374_v53 }
 0x178   : > { %1643 = vmatprep.subr.mxu1 %v2094_v32 }
 0x218   : > { %v1534_v6 = vpop.f32.mrf.mxu1 }
 0x219   : > { %v564_v16 = vadd.f32 %v1534_v6, %v2453_v7 }
 0x21a   : > { %v558_v8 = vpop.f32.mrf.mxu1 }
 0x21b   : > { %v559_v9 = vadd.f32 %v2453_v7, %v558_v8  ;;  %v578_v18 = vmax.f32 %v564_v16, 0.0 }
 0x21c   : > { %v2496_v17 = vpop.f32.mrf.mxu1 }
 0x21d   : > { %v577_v10 = vmax.f32 %v559_v9, 0.0  ;;  %v590_v20 = vadd.f32 %v2459_v11, %v578_v18  ;;  %v574_v6 = vadd.f32 %v2496_v17, %v2453_v7 }
 0x21e   : > { %v568_v19 = vpop.f32.mrf.mxu1 }
 0x21f   : > { %v589_v12 = vadd.f32 %v2459_v11, %v577_v10  ;;  %v569_v41 = vadd.f32 %v2453_v7, %v568_v19  ;;  %v580_v8 = vmax.f32 %v574_v6, 0.0 }
 0x221   : > { %v682_v13 = vadd.f32 %v681_v4, %v589_v12  ;;  %v592_v9 = vadd.f32 %v2459_v11, %v580_v8 }
 0x223   : > { %v685_v14 = vmax.f32 %v682_v13, 0.0 }
 0x225   : > { %1606 = vmatmul.mubr.f32.vlgmr.msra.gmra.mxu1 %v685_v14 }
 0x226   : > { %1644 = vmatpush3.msra.mxu1 %v2310_v31  ;;  %1675 = vmatprep.mubr.msk.f32.mxu1 %vm2095_vm0, %v2094_v32  ;;  %v923_v31 = vld [vmem:[#allocation9 + $0xc0] sm:$0xff] }
 0x227   : > { %1645 = vmatprep.subr.mxu1 %v2094_v32 }
 0x228   : > { %1646 = vmatpush3.msra.mxu1 %v2313_v33  ;;  %v921_v33 = vld [vmem:[#allocation9 + $0xb0] sm:$0xff] }
 0x229   : > { %1647 = vmatprep.subr.mxu1 %v2094_v32 }
 0x22a   : > { %1648 = vmatpush3.msra.mxu1 %v2317_v34  ;;  %v920_v34 = vld [vmem:[#allocation9 + $0xa8] sm:$0xff] }
 0x22b   : > { %1649 = vmatprep.subr.mxu1 %v2094_v32 }
 0x22c   : > { %1650 = vmatpush3.msra.mxu1 %v2321_v35  ;;  %v919_v35 = vld [vmem:[#allocation9 + $0xa0] sm:$0xff] }
 0x22d   : > { %1651 = vmatprep.subr.mxu1 %v2094_v32 }
 0x22e   : > { %1652 = vmatpush3.msra.mxu1 %v2325_v36  ;;  %v918_v36 = vld [vmem:[#allocation9 + $0x98] sm:$0xff] }
 0x22f   : > { %1653 = vmatprep.subr.mxu1 %v2094_v32 }
 0x230   : > { %1654 = vmatpush3.msra.mxu1 %v2329_v37  ;;  %v917_v37 = vld [vmem:[#allocation9 + $0x90] sm:$0xff] }
 0x231   : > { %1655 = vmatprep.subr.mxu1 %v2094_v32 }
 0x232   : > { %1656 = vmatpush3.msra.mxu1 %v2333_v38  ;;  %v916_v38 = vld [vmem:[#allocation9 + $0x88] sm:$0xff] }
 0x233   : > { %1657 = vmatprep.subr.mxu1 %v2094_v32 }
 0x234   : > { %1658 = vmatpush3.msra.mxu1 %v2337_v39  ;;  %v915_v39 = vld [vmem:[#allocation9 + $0x80] sm:$0xff] }
 0x235   : > { %1659 = vmatprep.subr.mxu1 %v2094_v32 }
 0x236   : > { %1660 = vmatpush3.msra.mxu1 %v2341_v40  ;;  %v1043_v40 = vld [vmem:[#allocation12 + $0x78] sm:$0xff] }
 0x237   : > { %1661 = vmatprep.subr.mxu1 %v2094_v32 }
 0x238   : > { %1662 = vmatpush3.msra.mxu1 %v2347_v42  ;;  %v579_v42 = vmax.f32 %v569_v41, 0.0 }
 0x239   : > { %1663 = vmatprep.subr.mxu1 %v2094_v32 }
 0x23a   : > { %1664 = vmatpush3.msra.mxu1 %v2352_v45  ;;  %v591_v43 = vadd.f32 %v2459_v11, %v579_v42 }
 0x23b   : > { %1665 = vmatprep.subr.mxu1 %v2094_v32 }
 0x23c   : > { %1666 = vmatpush3.msra.mxu1 %v2355_v48  ;;  %v1042_v48 = vld [vmem:[#allocation12 + $0x70] sm:$0xff] }
 0x23d   : > { %1667 = vmatprep.subr.mxu1 %v2094_v32 }
 0x23e   : > { %1668 = vmatpush3.msra.mxu1 %v2360_v50  ;;  %v1040_v50 = vld [vmem:[#allocation12 + $0x60] sm:$0xff] }
 0x23f   : > { %1669 = vmatprep.subr.mxu1 %v2094_v32 }
 0x240   : > { %1670 = vmatpush3.msra.mxu1 %v2364_v51  ;;  %v1039_v51 = vld [vmem:[#allocation12 + $0x58] sm:$0xff] }
 0x241   : > { %1671 = vmatprep.subr.mxu1 %v2094_v32 }
 0x242   : > { %1672 = vmatpush3.msra.mxu1 %v2367_v52  ;;  %v1038_v52 = vld [vmem:[#allocation12 + $0x50] sm:$0xff] }
 0x243   : > { %1673 = vmatprep.subr.mxu1 %v2094_v32  ;;  %v922_v32 = vld [vmem:[#allocation9 + $0xb8] sm:$0xff] }
 0x244   : > { %1674 = vmatpush3.msra.mxu1 %v2374_v53  ;;  %v1037_v53 = vld [vmem:[#allocation12 + $0x48] sm:$0xff] }
 0x245   : > { %1716 = vmatprep.subr.mxu1 %v1043_v40 }
 0x2e5   : > { %v755_v21 = vpop.f32.mrf.mxu1 }
 0x2e6   : > { %v756_v22 = vadd.f32 %v755_v21, %v590_v20 }
 0x2e7   : > { %v1607_v23 = vpop.f32.mrf.mxu1 }
 0x2e8   : > { %v759_v24 = vmax.f32 %v756_v22, 0.0 }
 0x2ea   : > { %1641 = vmatmul.mubr.f32.vlgmr.msra.gmra.mxu0 %v759_v24 }
 0x2eb   : > { %1679 = vmatpush3.msra.mxu0 %v930_v15  ;;  %1710 = vmatprep.mubr.f32.mxu0 %v685_v14  ;;  %v1306_v15 = vld [vmem:[%s2574_s5 + $0x4] ss:$0 sm:$0xff] }
 0x2ec   : > { %1680 = vmatprep.subr.mxu0 %v929_v25 }
 0x2ed   : > { %1681 = vmatpush3.msra.mxu0 %v929_v25 }
 0x2ee   : > { %1682 = vmatprep.subr.mxu0 %v928_v26 }
 0x2ef   : > { %1683 = vmatpush3.msra.mxu0 %v928_v26 }
 0x2f0   : > { %1684 = vmatprep.subr.mxu0 %v927_v27 }
 0x2f1   : > { %1685 = vmatpush3.msra.mxu0 %v927_v27 }
 0x2f2   : > { %1686 = vmatprep.subr.mxu0 %v926_v28 }
 0x2f3   : > { %1687 = vmatpush3.msra.mxu0 %v926_v28 }
 0x2f4   : > { %1688 = vmatprep.subr.mxu0 %v925_v29 }
 0x2f5   : > { %1689 = vmatpush3.msra.mxu0 %v925_v29 }
 0x2f6   : > { %1690 = vmatprep.subr.mxu0 %v924_v30 }
 0x2f7   : > { %1691 = vmatpush3.msra.mxu0 %v924_v30 }
 0x2f8   : > { %1692 = vmatprep.subr.mxu0 %v923_v31 }
 0x2f9   : > { %1693 = vmatpush3.msra.mxu0 %v923_v31 }
 0x2fa   : > { %1694 = vmatprep.subr.mxu0 %v922_v32 }
 0x2fb   : > { %1695 = vmatpush3.msra.mxu0 %v922_v32 }
 0x2fc   : > { %1696 = vmatprep.subr.mxu0 %v921_v33 }
 0x2fd   : > { %1697 = vmatpush3.msra.mxu0 %v921_v33 }
 0x2fe   : > { %1698 = vmatprep.subr.mxu0 %v920_v34 }
 0x2ff   : > { %1699 = vmatpush3.msra.mxu0 %v920_v34 }
 0x300   : > { %1700 = vmatprep.subr.mxu0 %v919_v35 }
 0x301   : > { %1701 = vmatpush3.msra.mxu0 %v919_v35 }
 0x302   : > { %1702 = vmatprep.subr.mxu0 %v918_v36 }
 0x303   : > { %1703 = vmatpush3.msra.mxu0 %v918_v36 }
 0x304   : > { %1704 = vmatprep.subr.mxu0 %v917_v37 }
 0x305   : > { %1705 = vmatpush3.msra.mxu0 %v917_v37 }
 0x306   : > { %1706 = vmatprep.subr.mxu0 %v916_v38 }
 0x307   : > { %1707 = vmatpush3.msra.mxu0 %v916_v38 }
 0x308   : > { %1708 = vmatprep.subr.mxu0 %v915_v39 }
 0x309   : > { %1709 = vmatpush3.msra.mxu0 %v915_v39 }
 0x30a   : > { %1711 = vmatmul.mubr.f32.vlgmr.msra.gmra.mxu0 %v759_v24 }
 0x3aa   : > { %v829_v44 = vpop.f32.mrf.mxu0 }
 0x3ab   : > { %v830_v45 = vadd.f32 %v829_v44, %v591_v43 }
 0x3ac   : > { %v1642_v46 = vpop.f32.mrf.mxu0 }
 0x3ad   : > { %v833_v47 = vmax.f32 %v830_v45, 0.0 }
 0x3af   : > { %1676 = vmatmul.mubr.f32.vlgmr.msra.gmra.mxu1 %v833_v47  ;;  %1713 = vmatprep.mubr.f32.mxu0 %v833_v47 }
 0x3b0   : > { %1717 = vmatpush3.msra.mxu1 %v1043_v40 }
 0x3b1   : > { %1718 = vmatprep.subr.mxu1 %v1042_v48 }
 0x3b2   : > { %1719 = vmatpush3.msra.mxu1 %v1042_v48 }
 0x3b3   : > { %1720 = vmatprep.subr.mxu1 %v1041_v49 }
 0x3b4   : > { %1721 = vmatpush3.msra.mxu1 %v1041_v49 }
 0x3b5   : > { %1722 = vmatprep.subr.mxu1 %v1040_v50 }
 0x3b6   : > { %1723 = vmatpush3.msra.mxu1 %v1040_v50 }
 0x3b7   : > { %1724 = vmatprep.subr.mxu1 %v1039_v51 }
 0x3b8   : > { %1725 = vmatpush3.msra.mxu1 %v1039_v51 }
 0x3b9   : > { %1726 = vmatprep.subr.mxu1 %v1038_v52 }
 0x3ba   : > { %1727 = vmatpush3.msra.mxu1 %v1038_v52 }
 0x3bb   : > { %1728 = vmatprep.subr.mxu1 %v1037_v53 }
 0x3bc   : > { %1729 = vmatpush3.msra.mxu1 %v1037_v53 }
 0x3bd   : > { %1730 = vmatprep.subr.mxu1 %v1036_v54 }
 0x3be   : > { %1731 = vmatpush3.msra.mxu1 %v1036_v54 }
 0x3bf   : > { %1732 = vmatprep.subr.mxu1 %v1035_v55 }
 0x3c0   : > { %1733 = vmatpush3.msra.mxu1 %v1035_v55 }
 0x3c1   : > { %1734 = vmatprep.subr.mxu1 %v1034_v56 }
 0x3c2   : > { %1735 = vmatpush3.msra.mxu1 %v1034_v56 }
 0x3c3   : > { %1736 = vmatprep.subr.mxu1 %v1033_v57 }
 0x3c4   : > { %1737 = vmatpush3.msra.mxu1 %v1033_v57 }
 0x3c5   : > { %1738 = vmatprep.subr.mxu1 %v1032_v58 }
 0x3c6   : > { %1739 = vmatpush3.msra.mxu1 %v1032_v58 }
 0x3c7   : > { %1740 = vmatprep.subr.mxu1 %v1031_v59 }
 0x3c8   : > { %1741 = vmatpush3.msra.mxu1 %v1031_v59 }
 0x3c9   : > { %1742 = vmatprep.subr.mxu1 %v1030_v60 }
 0x3ca   : > { %v1712_v63 = vpop.f32.mrf.mxu0  ;;  %1743 = vmatpush3.msra.mxu1 %v1030_v60 }
 0x3cb   : > { %1744 = vmatprep.subr.mxu1 %v1029_v61  ;;  %v1011_v1 = vadd.f32 %v1712_v63, %v1304_v62 }
 0x3cc   : > { %v1005_v2 = vpop.f32.mrf.mxu0  ;;  %1745 = vmatpush3.msra.mxu1 %v1029_v61 }
 0x3cd   : > { %v1006_v3 = vadd.f32 %v1304_v62, %v1005_v2  ;;  %1746 = vmatprep.subr.mxu1 %v1028_v0  ;;  %v1025_v5 = vmax.f32 %v1011_v1, 0.0 }
 0x3ce   : > { %1747 = vmatpush3.msra.mxu1 %v1028_v0 }
 0x3cf   : > { %v1024_v4 = vmax.f32 %v1006_v3, 0.0 }
 0x3d1   : > { %1748 = vmatprep.mubr.f32.mxu1 %v1024_v4 }
 0x3d2   : > { %1749 = vmatmul.mubr.f32.vlgmr.msra.gmra.mxu1 %v1025_v5 }
 0x46f   : > { %v903_v10 = vpop.f32.mrf.mxu1 }
 0x470   : > { %v904_v12 = vadd.f32 %v903_v10, %v592_v9 }
 0x471   : > { %v1677_v13 = vpop.f32.mrf.mxu1 }
 0x472   : > { %v907_v14 = vmax.f32 %v904_v12, 0.0 }
 0x474   : > { %909 = vst [vmem:[#allocation2] sm:$0xff] %v907_v14  ;;  %1714 = vmatmul.mubr.f32.gmra.mxu0 %v907_v14 }
 0x492   : > { %v1750_v16 = vpop.f32.mrf.mxu1 }
 0x493   : > { %v1124_v18 = vadd.f32 %v1750_v16, %v1306_v15 }
 0x494   : > { %v1118_v19 = vpop.f32.mrf.mxu1 }
 0x495   : > { %1138 = vst [vmem:[%s2305_s1 + $0x8] sm:$0xff] %v1124_v18  ;;  %v1119_v7 = vadd.f32 %v1306_v15, %v1118_v19 }
 0x497   : > { %1137 = vst [vmem:[%s2305_s1] sm:$0xff] %v1119_v7 }
 0x534   : > { %v1715_v11 = vpop.f32.mrf.mxu0 }
 0x535   : > { %v1021_v17 = vadd.f32 %v1715_v11, %v1304_v62 }
 0x536   : > { %v1015_v20 = vpop.f32.mrf.mxu0 }
 0x537   : > { %v1016_v21 = vadd.f32 %v1304_v62, %v1015_v20  ;;  %v1027_v23 = vmax.f32 %v1021_v17, 0.0 }
 0x539   : > { %v1026_v22 = vmax.f32 %v1016_v21, 0.0 }
 0x53b   : > { %1751 = vmatprep.mubr.f32.mxu1 %v1026_v22 }
 0x53c   : > { %1752 = vmatmul.mubr.f32.gmra.mxu1 %v1027_v23 }
 0x5fc   : > { %v1753_v24 = vpop.f32.mrf.mxu1 }
 0x5fd   : > { %v1134_v25 = vadd.f32 %v1753_v24, %v1306_v15 }
 0x5fe   : > { %v1128_v26 = vpop.f32.mrf.mxu1 }
 0x5ff   : > { %1140 = vst [vmem:[%s2305_s1 + $0x18] sm:$0xff] %v1134_v25  ;;  %v1129_v27 = vadd.f32 %v1306_v15, %v1128_v26 }
 0x601   : > { %1139 = vst [vmem:[%s2305_s1 + $0x10] sm:$0xff] %v1129_v27 }
 0x602   : > { %2009 = shalt.err (!%p2006_p10)
}
 0x603   : > { %s2010_s1 = scalar_lea.hbm %s2517_s29, 512  ;;  %s2014_s12 = scalar_lea.hbm %s2575_s6, 1024 }
 0x604   : > { %p2011_p12 = scmp.ne.s32.totalorder %s2517_s29, %s2010_s1  ;;  %p2015_p3 = scmp.lt.s32.totalorder %s2517_s29, %s2575_s6 }
 0x605   : > { %p2016_p9 = scmp.lt.s32.totalorder %s2014_s12, %s2010_s1 }
 0x606   : > { %p2012_p7 = pnand %p2011_p12, %p2257_p0 }
 0x607   : > { %p2017_p8 = por %p2016_p9, %p2015_p3 }
 0x608   : > { %p2013_p6 = pneg %p2012_p7 }
 0x60a   : > { %p2018_p1 = pnand %p2017_p8, %p2013_p6 }
 0x60c   : > { %2021 = shalt.err (!%p2018_p1)
}
 0x60d   : > { %s2097_s17 = smov 128   ;;  %s2098_s27 = smov 8  }
 0x60e   : > { %1772 = dma.vmem_to_hbm [thread:$0]  (%p2257_p0), %s2519_s2, 512, %s2517_s29, %s1142_s7, %s2097_s17, %s2097_s17, %s2098_s27  }
 0x60f PF: > { %s1171_s16 = sand.u32 1, %s2064_s21   ;;  %p2592_p4 = scmp.ne.s32.totalorder %s2583_s8, 0 }
 0x610   : > { %p2593_p13 = scmp.ge.s32.totalorder %s2084_s26, 2  ;;  %s1172_s9 = scalar_lea.sflag [#allocation6], %s1171_s16 }
 0x612   : > { %p1792_p11 = pnand %p2593_p13, %p2592_p4 }
 0x614   : > { %p1793_p2 = pneg %p1792_p11 }
 0x616   : > { %2059 = dma.done.wait (%p1793_p2), %s1172_s9, 512  }
 0x617   : > { %2061 = vsyncadd (%p1793_p2), %s1172_s9, 4294966784  ;;  %s24_s26 = sadd.s32 1, %s2084_s26   ;;  %s2594_s21 = smov %s2068_s22 }
 0x618   : > { %p21_p5 = scmp.ge.s32.totalorder %s24_s26, 4   ;;  %s2595_s22 = smov %s2072_s23 }
 0x619   : > { %s2596_s23 = smov %s2266_s20  ;;  %s2597_s24 = smov %s2080_s25 }
 0x61a   : > { %s2598_s25 = smov %s2600_s10  ;;  %23 = sbr.rel (!%p21_p5) target bundleno = 11 (0xb), region = 117 }
 0x61f   :  { %1177 = vsyncpa [#allocation5], 1 }
 0x620   :  { %1179 = vsyncpa [#allocation5 + $0x1], 1 }
 0x621   :  { %1180 = vsyncpa [#allocation8], 1 }
 0x622   :  { %1181 = vsyncpa [#allocation11], 1 }
 0x623   :  { %1182 = vsyncpa [#allocation6], 1 }
 0x624   :  { %1184 = vsyncpa [#allocation6 + $0x1], 1 }

</bundles_post_ra>
